<compile_context>
chip_gen: v7x
topology: tpu7x:2x2x1
jax: 0.10.0
libtpu: 0.0.40
codegen_flags: <defaults>
</compile_context>

<pallas_src>
import functools

import jax
import jax.numpy as jnp
from jax.experimental import pallas as pl
from jax.experimental.pallas import tpu as pltpu

BN_EPS = 1e-5
LANE = 128
SUBLANE = 8


def _round_up(n, m):
    return ((n + m - 1) // m) * m


def _mlp_kernel(layer_sizes, w_off, p_off, x_ref, s_ref, o_ref):
    """Fused MLP forward over one block of G independent evaluations.

    x_ref: (G, B, in_dim)    G independent batches of B rows each.
    s_ref: (rows, 128)       single resident param slab:
                               rows [w_off[i], w_off[i]+in_f) = layer i weight (in, out),
                               then per hidden layer the rows [bias, gamma, beta]
                               starting at p_off, then the last layer's bias.
                               Everything zero-padded to 128 lanes.
    o_ref: (G, B, 128)       lane-dense output (only [:out_dim] lanes valid).
    """
    G, B, _ = x_ref.shape
    num_layers = len(layer_sizes) - 1
    inv_b = 1.0 / B

    h = x_ref[...].astype(jnp.float32).reshape(G * B, layer_sizes[0])

    prow = p_off
    for i in range(num_layers - 1):
        in_f, out_f = layer_sizes[i], layer_sizes[i + 1]
        w = s_ref[w_off[i]:w_off[i] + in_f, 0:out_f]            # (in_f, out_f)
        b = s_ref[prow + 0:prow + 1, 0:out_f]                   # (1, out_f)
        g = s_ref[prow + 1:prow + 2, 0:out_f]
        bt = s_ref[prow + 2:prow + 3, 0:out_f]
        prow += 3

        # Linear on the MXU over all G*B rows at once.
        y = jnp.dot(h, w, preferred_element_type=jnp.float32) + b   # (G*B, out_f)
        y = y.reshape(G, B, out_f)

        # BatchNorm1d (training semantics), one group per evaluation.
        # One-pass stats; affine folded into a single scale + shift.
        s1 = jnp.sum(y, axis=1, keepdims=True)                  # (G, 1, out_f)
        s2 = jnp.sum(y * y, axis=1, keepdims=True)
        mean = s1 * inv_b
        var = s2 * inv_b - mean * mean                          # biased batch var
        scale = g * jax.lax.rsqrt(var + BN_EPS)                 # (G, 1, out_f)
        shift = bt - mean * scale
        y = y * scale + shift

        # sigmoid as a single EUP transcendental (tanh half-angle form).
        h = (0.5 * (jnp.tanh(0.5 * y) + 1.0)).reshape(G * B, out_f)

    # Last Linear (weight/bias zero-padded to 128 lanes -> lane-dense store), then /32.
    in_f = layer_sizes[-2]
    off = w_off[num_layers - 1]
    w = s_ref[off:off + in_f, :]                                # (in_f, 128)
    b = s_ref[prow:prow + 1, :]                                 # (1, 128)
    out = jnp.dot(h, w, preferred_element_type=jnp.float32) + b  # (G*B, 128)
    o_ref[...] = (out * (1.0 / 32.0)).reshape(G, B, LANE).astype(o_ref.dtype)


def _pack_params(params):
    """Pack all parameters into a single (rows, 128) f32 slab.

    Weights first: each Linear weight (in, out) zero-padded to (round_up(in,8), 128)
    and row-stacked (returns per-layer row offsets).  Then, per hidden layer, the rows
    [bias, gamma, beta], then the last layer's bias, each zero-padded to 128 lanes;
    total row count padded to a multiple of 8.
    """
    blocks, w_off, r = [], [], 0
    for p in params:
        w = p["w"].astype(jnp.float32)
        rows = _round_up(w.shape[0], SUBLANE)
        blk = jnp.zeros((rows, LANE), jnp.float32).at[:w.shape[0], :w.shape[1]].set(w)
        blocks.append(blk)
        w_off.append(r)
        r += rows

    def pad_row(v):
        v = v.astype(jnp.float32).reshape(1, -1)
        return jnp.zeros((1, LANE), jnp.float32).at[:, :v.shape[1]].set(v)

    p_off = r
    n_prow = 0
    for p in params[:-1]:
        blocks += [pad_row(p["b"]), pad_row(p["gamma"]), pad_row(p["beta"])]
        n_prow += 3
    blocks.append(pad_row(params[-1]["b"]))
    n_prow += 1

    total = r + n_prow
    total_pad = _round_up(total, SUBLANE)
    if total_pad != total:
        blocks.append(jnp.zeros((total_pad - total, LANE), jnp.float32))
    slab = jnp.concatenate(blocks, axis=0)
    return slab, tuple(w_off), p_off


def hamiltonian_nn_forward(x, params, *, groups_per_block=16):
    """x: (T, B, in_dim) — T independent forward evaluations, each a batch of B rows
    (B is the BatchNorm group, i.e. one PyTorch forward() call in train mode).
    Returns (T, B, out_dim) float32."""
    T, B, in_dim = x.shape
    layer_sizes = tuple([in_dim] + [int(p["w"].shape[1]) for p in params])
    out_dim = layer_sizes[-1]

    slab, w_off, p_off = _pack_params(params)

    G = min(groups_per_block, T)
    T_pad = _round_up(T, G)
    if T_pad != T:
        x = jnp.concatenate([x, jnp.zeros((T_pad - T, B, in_dim), x.dtype)], axis=0)

    kernel = functools.partial(_mlp_kernel, layer_sizes, w_off, p_off)

    out_padded = pl.pallas_call(
        kernel,
        out_shape=jax.ShapeDtypeStruct((T_pad, B, LANE), jnp.float32),
        grid=(T_pad // G,),
        in_specs=[
            pl.BlockSpec((G, B, in_dim), lambda t: (t, 0, 0)),   # x: per-step block
            pl.BlockSpec(slab.shape, lambda t: (0, 0)),          # params: resident
        ],
        out_specs=pl.BlockSpec((G, B, LANE), lambda t: (t, 0, 0)),
        compiler_params=pltpu.CompilerParams(
            dimension_semantics=("parallel",)),
    )(x, slab)

    return out_padded[:T, :, :out_dim]


def init_params(key, layer_sizes):
    """Deterministic init mimicking PyTorch defaults:
       Linear: U(-1/sqrt(fan_in), 1/sqrt(fan_in)) for weight and bias.
       BatchNorm1d: weight=1, bias=0."""
    params = []
    n_layers = len(layer_sizes) - 1
    for i in range(n_layers):
        fan_in, fan_out = layer_sizes[i], layer_sizes[i + 1]
        key, kw, kb = jax.random.split(key, 3)
        bound = 1.0 / (fan_in ** 0.5)
        w = jax.random.uniform(kw, (fan_in, fan_out), jnp.float32, -bound, bound)
        b = jax.random.uniform(kb, (1, fan_out), jnp.float32, -bound, bound)
        if i < n_layers - 1:
            params.append({
                "w": w, "b": b,
                "gamma": jnp.ones((1, fan_out), jnp.float32),
                "beta": jnp.zeros((1, fan_out), jnp.float32),
            })
        else:
            params.append({"w": w, "b": b})
    return params


def reference_forward(x, params):
    """Pure-JAX reference: independent forward per stacked evaluation."""
    h = x.astype(jnp.float32)                      # (T, B, F)
    for p in params[:-1]:
        h = h @ p["w"] + p["b"]
        mean = jnp.mean(h, axis=1, keepdims=True)
        var = jnp.mean((h - mean) ** 2, axis=1, keepdims=True)
        h = (h - mean) * jax.lax.rsqrt(var + BN_EPS) * p["gamma"] + p["beta"]
        h = jax.nn.sigmoid(h)
    out = h @ params[-1]["w"] + params[-1]["b"]
    return out / 32.0


if __name__ == "__main__":
    layer_sizes = [4, 32, 32, 2]   # model_specs[0]: phase-space (q, p) -> output
    B = 8                          # per-forward batch (BatchNorm group size)
    T = 64                         # stacked independent forward evaluations

    key = jax.random.PRNGKey(0)
    key, kx = jax.random.split(key)
    x = jax.random.normal(kx, (T, B, layer_sizes[0]), jnp.float32)
    params = init_params(key, layer_sizes)

    out = hamiltonian_nn_forward(x, params)
    out = jax.block_until_ready(out)

    ref = reference_forward(x, params)
    assert out.shape == (T, B, layer_sizes[-1])
    assert jnp.allclose(out, ref, atol=1e-4, rtol=1e-4), "mismatch vs pure-JAX reference"

    print("KERNEL_OK")
</pallas_src>

<mosaic_0001>
module attributes {stable_mosaic.version = 11 : i64} {
  func.func @_mlp_kernel(%arg0: i32, %arg1: memref<16x8x4xf32, #tpu.memory_space<vmem>>, %arg2: memref<80x128xf32, #tpu.memory_space<vmem>>, %arg3: memref<16x8x128xf32, #tpu.memory_space<vmem>>) attributes {dimension_semantics = [#tpu.dimension_semantics<parallel>], iteration_bounds = array<i64: 4>, scalar_prefetch = 0 : i64, scratch_operands = 0 : i64, tpu.core_type = #tpu.core_type<tc>, window_params = [{transform_indices = @transform_0, window_bounds = array<i64: 16, 8, 4>}, {pipeline_mode = #tpu.pipeline_mode<synchronous>, transform_indices = @transform_1, window_bounds = array<i64: 80, 128>}, {transform_indices = @transform_2, window_bounds = array<i64: 16, 8, 128>}]} {
    %c0 = arith.constant 0 : index
    %c0_0 = arith.constant 0 : index
    %c0_1 = arith.constant 0 : index
    %0 = vector.load %arg1[%c0, %c0_0, %c0_1] : memref<16x8x4xf32, #tpu.memory_space<vmem>>, vector<16x8x4xf32>
    %1 = vector.shape_cast %0 : vector<16x8x4xf32> to vector<128x4xf32>
    %c0_2 = arith.constant 0 : index
    %c0_3 = arith.constant 0 : index
    %2 = vector.load %arg2[%c0_2, %c0_3] : memref<80x128xf32, #tpu.memory_space<vmem>>, vector<4x32xf32>
    %c72 = arith.constant 72 : index
    %c0_4 = arith.constant 0 : index
    %3 = vector.load %arg2[%c72, %c0_4] : memref<80x128xf32, #tpu.memory_space<vmem>>, vector<1x32xf32>
    %c73 = arith.constant 73 : index
    %c0_5 = arith.constant 0 : index
    %4 = vector.load %arg2[%c73, %c0_5] : memref<80x128xf32, #tpu.memory_space<vmem>>, vector<1x32xf32>
    %c74 = arith.constant 74 : index
    %c0_6 = arith.constant 0 : index
    %5 = vector.load %arg2[%c74, %c0_6] : memref<80x128xf32, #tpu.memory_space<vmem>>, vector<1x32xf32>
    %cst = arith.constant dense<0.000000e+00> : vector<128x32xf32>
    %6 = tpu.matmul %1, %2, %cst {dimension_numbers = #tpu.dot_dimension_numbers<[1], [0], [0], [1], [0, 0, 1, 1], [], []>} : vector<128x4xf32>, vector<4x32xf32>, vector<128x32xf32> -> vector<128x32xf32>
    %7 = vector.broadcast %3 : vector<1x32xf32> to vector<128x32xf32>
    %8 = arith.addf %6, %7 : vector<128x32xf32>
    %9 = vector.shape_cast %8 : vector<128x32xf32> to vector<16x8x32xf32>
    %cst_7 = arith.constant dense<0.000000e+00> : vector<16x32xf32>
    %10 = vector.multi_reduction <add>, %9, %cst_7 [1] : vector<16x8x32xf32> to vector<16x32xf32>
    %11 = vector.shape_cast %10 : vector<16x32xf32> to vector<16x1x32xf32>
    %12 = arith.mulf %9, %9 : vector<16x8x32xf32>
    %cst_8 = arith.constant dense<0.000000e+00> : vector<16x32xf32>
    %13 = vector.multi_reduction <add>, %12, %cst_8 [1] : vector<16x8x32xf32> to vector<16x32xf32>
    %14 = vector.shape_cast %13 : vector<16x32xf32> to vector<16x1x32xf32>
    %cst_9 = arith.constant 1.250000e-01 : f32
    %15 = vector.broadcast %cst_9 : f32 to vector<16x1x32xf32>
    %16 = arith.mulf %11, %15 : vector<16x1x32xf32>
    %cst_10 = arith.constant 1.250000e-01 : f32
    %17 = vector.broadcast %cst_10 : f32 to vector<16x1x32xf32>
    %18 = arith.mulf %14, %17 : vector<16x1x32xf32>
    %19 = arith.mulf %16, %16 : vector<16x1x32xf32>
    %20 = arith.subf %18, %19 : vector<16x1x32xf32>
    %cst_11 = arith.constant 9.99999974E-6 : f32
    %21 = vector.broadcast %cst_11 : f32 to vector<16x1x32xf32>
    %22 = arith.addf %20, %21 : vector<16x1x32xf32>
    %23 = math.rsqrt %22 : vector<16x1x32xf32>
    %24 = vector.shape_cast %4 : vector<1x32xf32> to vector<1x1x32xf32>
    %25 = vector.broadcast %24 : vector<1x1x32xf32> to vector<16x1x32xf32>
    %26 = arith.mulf %25, %23 : vector<16x1x32xf32>
    %27 = arith.mulf %16, %26 : vector<16x1x32xf32>
    %28 = vector.shape_cast %5 : vector<1x32xf32> to vector<1x1x32xf32>
    %29 = vector.broadcast %28 : vector<1x1x32xf32> to vector<16x1x32xf32>
    %30 = arith.subf %29, %27 : vector<16x1x32xf32>
    %31 = vector.broadcast %26 : vector<16x1x32xf32> to vector<16x8x32xf32>
    %32 = arith.mulf %9, %31 : vector<16x8x32xf32>
    %33 = vector.broadcast %30 : vector<16x1x32xf32> to vector<16x8x32xf32>
    %34 = arith.addf %32, %33 : vector<16x8x32xf32>
    %cst_12 = arith.constant 5.000000e-01 : f32
    %35 = vector.broadcast %cst_12 : f32 to vector<16x8x32xf32>
    %36 = arith.mulf %35, %34 : vector<16x8x32xf32>
    %37 = math.tanh %36 : vector<16x8x32xf32>
    %cst_13 = arith.constant 1.000000e+00 : f32
    %38 = vector.broadcast %cst_13 : f32 to vector<16x8x32xf32>
    %39 = arith.addf %37, %38 : vector<16x8x32xf32>
    %cst_14 = arith.constant 5.000000e-01 : f32
    %40 = vector.broadcast %cst_14 : f32 to vector<16x8x32xf32>
    %41 = arith.mulf %40, %39 : vector<16x8x32xf32>
    %42 = vector.shape_cast %41 : vector<16x8x32xf32> to vector<128x32xf32>
    %c8 = arith.constant 8 : index
    %c0_15 = arith.constant 0 : index
    %43 = vector.load %arg2[%c8, %c0_15] : memref<80x128xf32, #tpu.memory_space<vmem>>, vector<32x32xf32>
    %c75 = arith.constant 75 : index
    %c0_16 = arith.constant 0 : index
    %44 = vector.load %arg2[%c75, %c0_16] : memref<80x128xf32, #tpu.memory_space<vmem>>, vector<1x32xf32>
    %c76 = arith.constant 76 : index
    %c0_17 = arith.constant 0 : index
    %45 = vector.load %arg2[%c76, %c0_17] : memref<80x128xf32, #tpu.memory_space<vmem>>, vector<1x32xf32>
    %c77 = arith.constant 77 : index
    %c0_18 = arith.constant 0 : index
    %46 = vector.load %arg2[%c77, %c0_18] : memref<80x128xf32, #tpu.memory_space<vmem>>, vector<1x32xf32>
    %cst_19 = arith.constant dense<0.000000e+00> : vector<128x32xf32>
    %47 = tpu.matmul %42, %43, %cst_19 {dimension_numbers = #tpu.dot_dimension_numbers<[1], [0], [0], [1], [0, 0, 1, 1], [], []>} : vector<128x32xf32>, vector<32x32xf32>, vector<128x32xf32> -> vector<128x32xf32>
    %48 = vector.broadcast %44 : vector<1x32xf32> to vector<128x32xf32>
    %49 = arith.addf %47, %48 : vector<128x32xf32>
    %50 = vector.shape_cast %49 : vector<128x32xf32> to vector<16x8x32xf32>
    %cst_20 = arith.constant dense<0.000000e+00> : vector<16x32xf32>
    %51 = vector.multi_reduction <add>, %50, %cst_20 [1] : vector<16x8x32xf32> to vector<16x32xf32>
    %52 = vector.shape_cast %51 : vector<16x32xf32> to vector<16x1x32xf32>
    %53 = arith.mulf %50, %50 : vector<16x8x32xf32>
    %cst_21 = arith.constant dense<0.000000e+00> : vector<16x32xf32>
    %54 = vector.multi_reduction <add>, %53, %cst_21 [1] : vector<16x8x32xf32> to vector<16x32xf32>
    %55 = vector.shape_cast %54 : vector<16x32xf32> to vector<16x1x32xf32>
    %cst_22 = arith.constant 1.250000e-01 : f32
    %56 = vector.broadcast %cst_22 : f32 to vector<16x1x32xf32>
    %57 = arith.mulf %52, %56 : vector<16x1x32xf32>
    %cst_23 = arith.constant 1.250000e-01 : f32
    %58 = vector.broadcast %cst_23 : f32 to vector<16x1x32xf32>
    %59 = arith.mulf %55, %58 : vector<16x1x32xf32>
    %60 = arith.mulf %57, %57 : vector<16x1x32xf32>
    %61 = arith.subf %59, %60 : vector<16x1x32xf32>
    %cst_24 = arith.constant 9.99999974E-6 : f32
    %62 = vector.broadcast %cst_24 : f32 to vector<16x1x32xf32>
    %63 = arith.addf %61, %62 : vector<16x1x32xf32>
    %64 = math.rsqrt %63 : vector<16x1x32xf32>
    %65 = vector.shape_cast %45 : vector<1x32xf32> to vector<1x1x32xf32>
    %66 = vector.broadcast %65 : vector<1x1x32xf32> to vector<16x1x32xf32>
    %67 = arith.mulf %66, %64 : vector<16x1x32xf32>
    %68 = arith.mulf %57, %67 : vector<16x1x32xf32>
    %69 = vector.shape_cast %46 : vector<1x32xf32> to vector<1x1x32xf32>
    %70 = vector.broadcast %69 : vector<1x1x32xf32> to vector<16x1x32xf32>
    %71 = arith.subf %70, %68 : vector<16x1x32xf32>
    %72 = vector.broadcast %67 : vector<16x1x32xf32> to vector<16x8x32xf32>
    %73 = arith.mulf %50, %72 : vector<16x8x32xf32>
    %74 = vector.broadcast %71 : vector<16x1x32xf32> to vector<16x8x32xf32>
    %75 = arith.addf %73, %74 : vector<16x8x32xf32>
    %cst_25 = arith.constant 5.000000e-01 : f32
    %76 = vector.broadcast %cst_25 : f32 to vector<16x8x32xf32>
    %77 = arith.mulf %76, %75 : vector<16x8x32xf32>
    %78 = math.tanh %77 : vector<16x8x32xf32>
    %cst_26 = arith.constant 1.000000e+00 : f32
    %79 = vector.broadcast %cst_26 : f32 to vector<16x8x32xf32>
    %80 = arith.addf %78, %79 : vector<16x8x32xf32>
    %cst_27 = arith.constant 5.000000e-01 : f32
    %81 = vector.broadcast %cst_27 : f32 to vector<16x8x32xf32>
    %82 = arith.mulf %81, %80 : vector<16x8x32xf32>
    %83 = vector.shape_cast %82 : vector<16x8x32xf32> to vector<128x32xf32>
    %c40 = arith.constant 40 : index
    %c0_28 = arith.constant 0 : index
    %84 = vector.load %arg2[%c40, %c0_28] : memref<80x128xf32, #tpu.memory_space<vmem>>, vector<32x128xf32>
    %c78 = arith.constant 78 : index
    %c0_29 = arith.constant 0 : index
    %85 = vector.load %arg2[%c78, %c0_29] : memref<80x128xf32, #tpu.memory_space<vmem>>, vector<1x128xf32>
    %cst_30 = arith.constant dense<0.000000e+00> : vector<128x128xf32>
    %86 = tpu.matmul %83, %84, %cst_30 {dimension_numbers = #tpu.dot_dimension_numbers<[1], [0], [0], [1], [0, 0, 1, 1], [], []>} : vector<128x32xf32>, vector<32x128xf32>, vector<128x128xf32> -> vector<128x128xf32>
    %87 = vector.broadcast %85 : vector<1x128xf32> to vector<128x128xf32>
    %88 = arith.addf %86, %87 : vector<128x128xf32>
    %cst_31 = arith.constant 3.125000e-02 : f32
    %89 = vector.broadcast %cst_31 : f32 to vector<128x128xf32>
    %90 = arith.mulf %88, %89 : vector<128x128xf32>
    %91 = vector.shape_cast %90 : vector<128x128xf32> to vector<16x8x128xf32>
    %c0_32 = arith.constant 0 : index
    %c0_33 = arith.constant 0 : index
    %c0_34 = arith.constant 0 : index
    %92 = vector.load %arg3[%c0_32, %c0_33, %c0_34] : memref<16x8x128xf32, #tpu.memory_space<vmem>>, vector<16x8x128xf32>
    tpu.vector_store %arg3[%c0_32, %c0_33, %c0_34], %91 {strides = array<i32>} : memref<16x8x128xf32, #tpu.memory_space<vmem>>, vector<16x8x128xf32>,
    return
  }
  func.func @transform_0(%arg0: i32) -> (i32, i32, i32) {
    %c0_i32 = arith.constant 0 : i32
    %c0_i32_0 = arith.constant 0 : i32
    %c0_i32_1 = arith.constant 0 : i32
    return %arg0, %c0_i32, %c0_i32_0 : i32, i32, i32
  }
  func.func @transform_1(%arg0: i32) -> (i32, i32) {
    %c0_i32 = arith.constant 0 : i32
    %c0_i32_0 = arith.constant 0 : i32
    %c0_i32_1 = arith.constant 0 : i32
    return %c0_i32, %c0_i32_0 : i32, i32
  }
  func.func @transform_2(%arg0: i32) -> (i32, i32, i32) {
    %c0_i32 = arith.constant 0 : i32
    %c0_i32_0 = arith.constant 0 : i32
    %c0_i32_1 = arith.constant 0 : i32
    return %arg0, %c0_i32, %c0_i32_0 : i32, i32, i32
  }
}

</mosaic_0001>

<bundles_post_ra>
// kernel: tpu_custom_call.1
= control target key start
LH: loop header
LB: loop body
LE: loop exit
PB: predicated region body
PF: predicated region fallthrough
CT: control target
= control target key end

     0   :  { %7 = vsyncpa [#allocation3], 0  ;;  %s3511_s0 = inlined_call_operand.vmem [shape: f32[64,8,4], index: 0, kind: input, shape index: {}]   ;;  %s3512_s1 = inlined_call_operand.vmem [shape: f32[80,128], index: 1, kind: input, shape index: {}]   ;;  %s3513_s2 = inlined_call_operand.hbm [shape: f32[64,8,128], index: 2, kind: output, shape index: {}]  }
   0x1   :  { %9 = vsyncpa [#allocation3 + $0x1], 0  ;;  %s2579_s9 = smov 0   ;;  %s2581_s10 = smov 0  }
   0x2   :  { %s2583_s11 = smov 0   ;;  %s2585_s12 = smov 0  }
   0x3 LB: > { %s2600_s13 = sadd.s32 4294967295, %s2559_s12   ;;  %s2098_s14 = sadd.s32 4294967294, %s2559_s12   ;;  %s2559_s12 = sphi %s2585_s12, %s3519_s12   ;;  %s2555_s11 = sphi %s2583_s11, %s3518_s11   ;;  %s2551_s10 = sphi %s2581_s10, %s3517_s10   ;;  %s2547_s9 = sphi %s2579_s9, %s3516_s9  }
   0x4   : > { %s2604_s15 = sadd.s32 1, %s2559_s12   ;;  %s69_s16 = sadd.s32 1, %s2555_s11 }
   0x5   : > { %s66_s17 = ssub.s32 %s2559_s12, %s2604_s15  ;;  %p79_p0 = scmp.ne.s32.totalorder %s2555_s11, %s2551_s10 }
   0x6   : > { %p67_p1 = scmp.eq.s32.totalorder %s66_s17, 0  ;;  %p80_p2 = scmp.eq.s32.totalorder %s2600_s13, 3 }
   0x7   : > { %p85_p3 = scmp.ne.s32.totalorder %s2551_s10, %s2547_s9  ;;  %p86_p4 = scmp.eq.s32.totalorder %s2098_s14, 3 }
   0x8   : > { %s2615_s18 = scalar_select %p67_p1, %s2555_s11, %s69_s16  }
   0x9   : > { %p2617_p5 = por %p80_p2, %p79_p0  ;;  %p2621_p6 = por %p86_p4, %p85_p3 }
   0xa   : > { %p2101_p7 = scmp.ge.s32.totalorder %s2559_s12, 1  ;;  %p116_p8 = scmp.lt.s32.totalorder %s2559_s12, 5 }
   0xc   : > { %p117_p9 = pnand %p2101_p7, %p116_p8 }
   0xd   : > { %v161_v0 = vld [vmem:[%s3512_s1] sm:$0xf] (!%p117_p9)  ;;  %vm218_vm0 = vcmask (!%p117_p9), 1043456   ;;  %s2103_s23 = sshll.u32 (!%p117_p9), %s2600_s13, 4  ;;  %vm169_vm1 = vcmask (!%p117_p9), 31744   ;;  %vm367_vm2 = vcmask (!%p117_p9), 261120  }
   0xe   : > { %120 = sbr.rel (%p117_p9) target bundleno = 961 (0x3c1), region = 28  ;;  %2220 = vmatprep.subr.msk.mxu0 (!%p117_p9), %vm218_vm0, %v161_v0  ;;  %2326 = vmatprep.subr.msk.mxu1 (!%p117_p9), %vm218_vm0, %v161_v0  ;;  %p139_p10 = scmp.lt.s32.totalorder (!%p117_p9), %s2103_s23, 63  ;;  %v2653_v17 = vld [vmem:[%s3512_s1 + $0x48] ss:$0 sm:$0xff] (!%p117_p9) }
   0xf   : > { %2221 = vmatpush3.msk.msra.mxu0 (!%p117_p9), %vm218_vm0, %v161_v0  ;;  %2327 = vmatpush3.msk.msra.mxu1 (!%p117_p9), %vm218_vm0, %v161_v0  ;;  %s135_s14 = sand.u32 (!%p117_p9), 1, %s2551_s10   ;;  %s2561_s29 = smov (!%p117_p9), [#allocation2]  }
  0x10   : > { %s2102_s21 = sshll.u32 (!%p117_p9), %s135_s14, 7  ;;  %s2501_s30 = sshll.u32 (!%p117_p9), %s2561_s29, 4  ;;  %s2502_s30 = int_to_ptr.vmem [resolvable:$false] %s2501_s30 }
  0x11   : > { %s3427_s22 = scalar_lea.vmem (!%p117_p9), [#allocation2], %s2102_s21  ;;  %s2503_s3 = scalar_lea.vmem (!%p117_p9), %s2502_s30, 4096 }
  0x15   : > { %s3521_s23 = smov (!%p139_p10, %s2103_s23), 63 }
  0x16   : > { %s2104_s24 = sshll.u32 %s3521_s23, 3  ;;  %s2162_s23 = sshll.u32 %s2600_s13, 11 }
  0x17   : > { %s142_s27 = scalar_lea.vmem %s3511_s0, %s2104_s24  ;;  %s2036_s24 = sshll.u32 %s3427_s22, 4  ;;  %s3464_s24 = int_to_ptr.vmem [resolvable:$true] %s2036_s24 }
  0x18   : > { %v145_v1 = vld [vmem:[%s142_s27] sm:$0xff]  ;;  %v146_v3 = vld [vmem:[%s142_s27 + $0x8] sm:$0xff]  ;;  %v147_v5 = vld [vmem:[%s142_s27 + $0x10] sm:$0xff]  ;;  %s3470_s13 = scalar_lea.sflag [#allocation3], %s135_s14  ;;  %s2497_s28 = scalar_lea.vmem %s3464_s24, 2048 }
  0x19   : > { %v153_v2 = vld [vmem:[%s142_s27 + $0x40] sm:$0xff]  ;;  %2222 = vmatprep.mubr.msk.f32.mxu0 %vm169_vm1, %v145_v1  ;;  %v154_v4 = vld [vmem:[%s142_s27 + $0x48] sm:$0xff]  ;;  %v155_v6 = vld [vmem:[%s142_s27 + $0x50] sm:$0xff]  ;;  %p2498_p11 = scmp.ne.s32.totalorder %s3464_s24, %s2497_s28  ;;  %p2504_p0 = scmp.lt.s32.totalorder %s3464_s24, %s2502_s30 }
  0x1a   : > { %2234 = vmatprep.mubr.msk.f32.mxu1 %vm169_vm1, %v153_v2  ;;  %2223 = vmatmul.mubr.msk.f32.vlgmr.msra.gmra.mrb[0].mxu0 %vm169_vm1, %v146_v3  ;;  %v148_v7 = vld [vmem:[%s142_s27 + $0x18] sm:$0xff]  ;;  %v149_v9 = vld [vmem:[%s142_s27 + $0x20] sm:$0xff]  ;;  %v150_v11 = vld [vmem:[%s142_s27 + $0x28] sm:$0xff]  ;;  %p2505_p1 = scmp.lt.s32.totalorder %s2503_s3, %s2497_s28 }
  0x1b   : > { %2235 = vmatmul.mubr.msk.f32.vlgmr.msra.gmra.mrb[0].mxu1 %vm169_vm1, %v154_v4  ;;  %2225 = vmatprep.mubr.msk.f32.mxu0 %vm169_vm1, %v147_v5  ;;  %v156_v8 = vld [vmem:[%s142_s27 + $0x58] sm:$0xff]  ;;  %v157_v10 = vld [vmem:[%s142_s27 + $0x60] sm:$0xff]  ;;  %v158_v12 = vld [vmem:[%s142_s27 + $0x68] sm:$0xff]  ;;  %p2499_p12 = pnand %p2498_p11, %p2617_p5 }
  0x1c   : > { %2237 = vmatprep.mubr.msk.f32.mxu1 %vm169_vm1, %v155_v6  ;;  %v151_v13 = vld [vmem:[%s142_s27 + $0x30] sm:$0xff]  ;;  %v152_v15 = vld [vmem:[%s142_s27 + $0x38] sm:$0xff]  ;;  %p2506_p2 = por %p2505_p1, %p2504_p0 }
  0x1d   : > { %v159_v14 = vld [vmem:[%s142_s27 + $0x70] sm:$0xff]  ;;  %v160_v16 = vld [vmem:[%s142_s27 + $0x78] sm:$0xff]  ;;  %s3462_s27 = scalar_lea.hbm %s3513_s2, %s2162_s23  ;;  %p2500_p13 = pneg %p2499_p12 }
  0x1e   : > { %2226 = vmatmul.mubr.msk.f32.gmra.mrb[2].mxu0 %vm169_vm1, %v148_v7 }
  0x1f   : > { %2238 = vmatmul.mubr.msk.f32.gmra.mrb[2].mxu1 %vm169_vm1, %v156_v8  ;;  %2228 = vmatprep.mubr.msk.f32.mxu0 %vm169_vm1, %v149_v9  ;;  %p2507_p3 = pnand %p2506_p2, %p2500_p13 }
  0x20   : > { %2240 = vmatprep.mubr.msk.f32.mxu1 %vm169_vm1, %v157_v10 }
  0x22   : > { %2229 = vmatmul.mubr.msk.f32.gmra.mrb[4].mxu0 %vm169_vm1, %v150_v11 }
  0x23   : > { %2241 = vmatmul.mubr.msk.f32.gmra.mrb[4].mxu1 %vm169_vm1, %v158_v12  ;;  %2231 = vmatprep.mubr.msk.f32.mxu0 %vm169_vm1, %v151_v13 }
  0x24   : > { %2243 = vmatprep.mubr.msk.f32.mxu1 %vm169_vm1, %v159_v14 }
  0x26   : > { %2232 = vmatmul.mubr.msk.f32.gmra.mrb[6].mxu0 %vm169_vm1, %v152_v15 }
  0x27   : > { %2244 = vmatmul.mubr.msk.f32.gmra.mrb[6].mxu1 %vm169_vm1, %v160_v16 }
  0xed   : > { %v2224_v18 = vpop.f32.mrb[0].mxu0 }
  0xee   : > { %v2236_v19 = vpop.f32.mrb[0].mxu1  ;;  %v2656_v20 = vadd.f32 %v2224_v18, %v2653_v17  ;;  %v288_v21 = vpop.f32.mrb[1].mxu0 }
  0xef   : > { %v328_v22 = vpop.f32.mrb[1].mxu1  ;;  %v2659_v23 = vadd.f32 %v2653_v17, %v288_v21  ;;  %v2682_v49 = vadd.f32 %v2236_v19, %v2653_v17 }
  0xf0   : > { %v375_v24 = vsel %vm367_vm2, %v2656_v20, 0.0  ;;  %v481_v25 = vmul.f32 %v2656_v20, %v2656_v20  ;;  %v2689_v58 = vadd.f32 %v2653_v17, %v328_v22 }
  0xf1   : > { %v376_v26 = vrot.slane %v375_v24, 4  ;;  %v368_v27 = vsel %vm367_vm2, %v2659_v23, 0.0  ;;  %v480_v28 = vmul.f32 %v2659_v23, %v2659_v23  ;;  %v2227_v29 = vpop.f32.mrb[2].mxu0  ;;  %v431_v63 = vsel %vm367_vm2, %v2682_v49, 0.0 }
  0xf2   : > { %v2239_v30 = vpop.f32.mrb[2].mxu1  ;;  %v503_v31 = vsel %vm367_vm2, %v481_v25, 0.0  ;;  %v369_v32 = vrot.slane %v368_v27, 4  ;;  %v298_v33 = vpop.f32.mrb[3].mxu0  ;;  %v489_v0 = vmul.f32 %v2682_v49, %v2682_v49  ;;  %v432_v5 = vrot.slane %v431_v63, 4 }
  0xf3   : > { %v2670_v34 = vpop.f32.mrb[3].mxu1  ;;  %v377_v35 = vadd.f32 %v376_v26, %v375_v24  ;;  %v504_v36 = vrot.slane %v503_v31, 4  ;;  %v496_v38 = vsel %vm367_vm2, %v480_v28, 0.0  ;;  %v424_v8 = vsel %vm367_vm2, %v2689_v58, 0.0 }
  0xf4   : > { %v370_v37 = vadd.f32 %v369_v32, %v368_v27  ;;  %v497_v44 = vrot.slane %v496_v38, 4  ;;  %v559_v7 = vsel %vm367_vm2, %v489_v0, 0.0  ;;  %v488_v9 = vmul.f32 %v2689_v58, %v2689_v58 }
  0xf5   : > { %v378_v39 = vrot.slane %v377_v35, 2  ;;  %v505_v40 = vadd.f32 %v504_v36, %v503_v31  ;;  %v2673_v41 = vpop.f32.mrb[4].mxu0  ;;  %v2711_v14 = vadd.f32 %v2227_v29, %v2653_v17  ;;  %v2714_v15 = vadd.f32 %v2239_v30, %v2653_v17 }
  0xf6   : > { %v2675_v42 = vpop.f32.mrb[4].mxu1  ;;  %v371_v43 = vrot.slane %v370_v37, 2  ;;  %v2677_v45 = vpop.f32.mrb[5].mxu0  ;;  %v498_v51 = vadd.f32 %v497_v44, %v496_v38  ;;  %v433_v16 = vadd.f32 %v432_v5, %v431_v63  ;;  %v560_v18 = vrot.slane %v559_v7, 4 }
  0xf7   : > { %v2679_v46 = vpop.f32.mrb[5].mxu1  ;;  %v379_v47 = vadd.f32 %v378_v39, %v377_v35  ;;  %v506_v48 = vrot.slane %v505_v40, 2  ;;  %v425_v19 = vrot.slane %v424_v8, 4  ;;  %v552_v21 = vsel %vm367_vm2, %v488_v9, 0.0 }
  0xf8   : > { %v372_v50 = vadd.f32 %v371_v43, %v370_v37  ;;  %v499_v57 = vrot.slane %v498_v51, 2  ;;  %v389_v22 = vsel %vm367_vm2, %v2711_v14, 0.0  ;;  %v483_v24 = vmul.f32 %v2711_v14, %v2711_v14 }
  0xf9   : > { %v380_v52 = vrot.slane %v379_v47, 1  ;;  %v507_v53 = vadd.f32 %v506_v48, %v505_v40  ;;  %v2684_v54 = vpop.f32.mrb[6].mxu0  ;;  %v2722_v25 = vadd.f32 %v2653_v17, %v298_v33  ;;  %v390_v29 = vrot.slane %v389_v22, 4 }
  0xfa   : > { %v2686_v55 = vpop.f32.mrb[6].mxu1  ;;  %v373_v56 = vrot.slane %v372_v50, 1  ;;  %v2691_v59 = vpop.f32.mrb[7].mxu0  ;;  %v500_v2 = vadd.f32 %v499_v57, %v498_v51  ;;  %v517_v30 = vsel %vm367_vm2, %v483_v24, 0.0  ;;  %v445_v31 = vsel %vm367_vm2, %v2714_v15, 0.0 }
  0xfb   : > { %v2693_v60 = vpop.f32.mrb[7].mxu1  ;;  %v381_v61 = vadd.f32 %v380_v52, %v379_v47  ;;  %v508_v62 = vrot.slane %v507_v53, 1  ;;  %v491_v32 = vmul.f32 %v2714_v15, %v2714_v15  ;;  %v434_v35 = vrot.slane %v433_v16, 2 }
  0xfc   : > { %v374_v1 = vadd.f32 %v373_v56, %v372_v50  ;;  %v501_v6 = vrot.slane %v500_v2, 1  ;;  %v561_v36 = vadd.f32 %v560_v18, %v559_v7  ;;  %v426_v37 = vadd.f32 %v425_v19, %v424_v8 }
  0xfd   : > { %v509_v3 = vadd.f32 %v508_v62, %v507_v53  ;;  %v2699_v4 = vmul.f32 0.125, %v381_v61  ;;  %v391_v38 = vadd.f32 %v390_v29, %v389_v22  ;;  %v553_v33 = vrot.slane %v552_v21, 4 }
  0xfe   : > { %v502_v12 = vadd.f32 %v501_v6, %v500_v2  ;;  %v2708_v13 = vmul.f32 0.125, %v374_v1  ;;  %v518_v39 = vrot.slane %v517_v30, 4  ;;  %v382_v40 = vsel %vm367_vm2, %v2722_v25, 0.0 }
  0xff   : > { %v625_v10 = vmul.f32 0.125, %v509_v3  ;;  %v641_v11 = vmul.f32 %v2699_v4, %v2699_v4  ;;  %v392_v47 = vrot.slane %v391_v38, 2  ;;  %v446_v48 = vrot.slane %v445_v31, 4 }
 0x100   : > { %v624_v27 = vmul.f32 0.125, %v502_v12  ;;  %v640_v28 = vmul.f32 %v2708_v13, %v2708_v13  ;;  %v519_v50 = vadd.f32 %v518_v39, %v517_v30  ;;  %v573_v51 = vsel %vm367_vm2, %v491_v32, 0.0 }
 0x101   : > { %v657_v26 = vsub.f32 %v625_v10, %v641_v11  ;;  %v383_v52 = vrot.slane %v382_v40, 4  ;;  %v482_v53 = vmul.f32 %v2722_v25, %v2722_v25  ;;  %v435_v56 = vadd.f32 %v434_v35, %v433_v16 }
 0x102   : > { %v656_v44 = vsub.f32 %v624_v27, %v640_v28  ;;  %v562_v57 = vrot.slane %v561_v36, 2  ;;  %v427_v61 = vrot.slane %v426_v37, 2  ;;  %v393_v62 = vadd.f32 %v392_v47, %v391_v38 }
 0x103   : > { %v673_v43 = vadd.f32 1e-05, %v657_v26  ;;  %v554_v63 = vadd.f32 %v553_v33, %v552_v21  ;;  %v520_v0 = vrot.slane %v519_v50, 2  ;;  %v384_v1 = vadd.f32 %v383_v52, %v382_v40 }
 0x104   : > { %v510_v2 = vsel %vm367_vm2, %v482_v53, 0.0  ;;  %v394_v3 = vrot.slane %v393_v62, 1  ;;  %v447_v5 = vadd.f32 %v446_v48, %v445_v31  ;;  %v574_v6 = vrot.slane %v573_v51, 4 }
 0x105   : > { %2369 = vrsqrt.f32 %v673_v43  ;;  %v672_v7 = vadd.f32 1e-05, %v656_v44  ;;  %v521_v8 = vadd.f32 %v520_v0, %v519_v50  ;;  %v385_v9 = vrot.slane %v384_v1, 2 }
 0x106   : > { %v511_v10 = vrot.slane %v510_v2, 4  ;;  %v428_v11 = vadd.f32 %v427_v61, %v426_v37  ;;  %v555_v12 = vrot.slane %v554_v63, 2  ;;  %v395_v18 = vadd.f32 %v394_v3, %v393_v62 }
 0x107   : > { %v522_v16 = vrot.slane %v521_v8, 1  ;;  %v448_v19 = vrot.slane %v447_v5, 2  ;;  %v575_v22 = vadd.f32 %v574_v6, %v573_v51  ;;  %v386_v24 = vadd.f32 %v385_v9, %v384_v1 }
 0x108   : > { %v2739_v21 = vadd.f32 %v2653_v17, %v2670_v34  ;;  %v436_v26 = vrot.slane %v435_v56, 1  ;;  %v563_v27 = vadd.f32 %v562_v57, %v561_v36  ;;  %2371 = vrsqrt.f32 %v672_v7  ;;  %v2748_v36 = vld [vmem:[%s3512_s1 + $0x49] sm:$0x1] }
 0x109   : > { %v512_v28 = vadd.f32 %v511_v10, %v510_v2  ;;  %v429_v29 = vrot.slane %v428_v11, 1  ;;  %v556_v30 = vadd.f32 %v555_v12, %v554_v63  ;;  %v523_v31 = vadd.f32 %v522_v16, %v521_v8 }
 0x10a   : > { %v2741_v32 = vmul.f32 0.125, %v395_v18  ;;  %v449_v35 = vadd.f32 %v448_v19, %v447_v5  ;;  %v576_v37 = vrot.slane %v575_v22, 2  ;;  %v387_v38 = vrot.slane %v386_v24, 1 }
 0x10b   : > { %v438_v33 = vsel %vm367_vm2, %v2739_v21, 0.0  ;;  %v752_v39 = vlaneseq  ;;  %v437_v40 = vadd.f32 %v436_v26, %v435_v56  ;;  %v564_v43 = vrot.slane %v563_v27, 1 }
 0x10c   : > { %v513_v34 = vrot.slane %v512_v28, 2  ;;  %v430_v47 = vadd.f32 %v429_v29, %v428_v11  ;;  %v627_v48 = vmul.f32 0.125, %v523_v31  ;;  %v643_v50 = vmul.f32 %v2741_v32, %v2741_v32  ;;  %v2773_v29 = vld [vmem:[%s3512_s1 + $0x4a] sm:$0x1] }
 0x10d   : > { %v439_v51 = vrot.slane %v438_v33, 4  ;;  %v557_v52 = vrot.slane %v556_v30, 1  ;;  %v450_v53 = vrot.slane %v449_v35, 1  ;;  %v577_v57 = vadd.f32 %v576_v37, %v575_v22 }
 0x10e   : > { %v388_v61 = vadd.f32 %v387_v38, %v386_v24  ;;  %v753_v62 = vshrl.u32 %v752_v39, 7  ;;  %v565_v56 = vadd.f32 %v564_v43, %v563_v27  ;;  %v2752_v63 = vmul.f32 0.125, %v437_v40 }
 0x10f   : > { %v2370_v44 = vpop.eup %2369  ;;  %v514_v0 = vadd.f32 %v513_v34, %v512_v28  ;;  %v490_v2 = vmul.f32 %v2739_v21, %v2739_v21  ;;  %v2757_v5 = vmul.f32 0.125, %v430_v47  ;;  %v659_v6 = vsub.f32 %v627_v48, %v643_v50 }
 0x110   : > { %v705_v1 = vmul.f32 %v2370_v44, %v2748_v36  ;;  %v440_v8 = vadd.f32 %v439_v51, %v438_v33  ;;  %v558_v9 = vadd.f32 %v557_v52, %v556_v30  ;;  %v451_v10 = vadd.f32 %v450_v53, %v449_v35 }
 0x111   : > { %v515_v7 = vrot.slane %v514_v0, 1  ;;  %v578_v11 = vrot.slane %v577_v57, 1  ;;  %v2759_v12 = vmul.f32 0.125, %v388_v61  ;;  %v2761_v18 = vsub.s32 0, %v753_v62 }
 0x112   : > { %v2372_v3 = vpop.eup %2371  ;;  %v633_v16 = vmul.f32 0.125, %v565_v56  ;;  %v649_v19 = vmul.f32 %v2752_v63, %v2752_v63  ;;  %v721_v24 = vmul.f32 %v705_v1, %v2699_v4  ;;  %v566_v28 = vsel %vm367_vm2, %v490_v2, 0.0 }
 0x113   : > { %v516_v22 = vadd.f32 %v515_v7, %v514_v0  ;;  %v704_v26 = vmul.f32 %v2372_v3, %v2748_v36  ;;  %v642_v27 = vmul.f32 %v2759_v12, %v2759_v12  ;;  %v675_v30 = vadd.f32 1e-05, %v659_v6 }
 0x114   : > { %v441_v35 = vrot.slane %v440_v8, 2  ;;  %v2777_v37 = vadd.f32 %v2673_v41, %v2653_v17  ;;  %v632_v4 = vmul.f32 0.125, %v558_v9  ;;  %v648_v38 = vmul.f32 %v2757_v5, %v2757_v5 }
 0x115   : > { %v626_v31 = vmul.f32 0.125, %v516_v22  ;;  %v579_v33 = vadd.f32 %v578_v11, %v577_v57  ;;  %v2781_v39 = vmul.f32 0.125, %v451_v10  ;;  %v567_v43 = vrot.slane %v566_v28, 4 }
 0x116   : > { %v403_v34 = vsel %vm367_vm2, %v2777_v37, 0.0  ;;  %v485_v44 = vmul.f32 %v2777_v37, %v2777_v37  ;;  %v737_v47 = vsub.f32 %v2773_v29, %v721_v24  ;;  %v720_v41 = vmul.f32 %v704_v26, %v2708_v13 }
 0x117   : > { %v658_v40 = vsub.f32 %v626_v31, %v642_v27  ;;  %v404_v48 = vrot.slane %v403_v34, 4  ;;  %v2791_v50 = vadd.f32 %v2675_v42, %v2653_v17  ;;  %v759_v51 = vrot.slane %v705_v1, %v2761_v18 }
 0x118   : > { %2373 = vrsqrt.f32 %v675_v30  ;;  %v442_v52 = vadd.f32 %v441_v35, %v440_v8  ;;  %v531_v53 = vsel %vm367_vm2, %v485_v44, 0.0  ;;  %v635_v57 = vmul.f32 0.125, %v579_v33 }
 0x119   : > { %v651_v61 = vmul.f32 %v2781_v39, %v2781_v39  ;;  %v405_v62 = vadd.f32 %v404_v48, %v403_v34  ;;  %v532_v56 = vrot.slane %v531_v53, 4  ;;  %v665_v0 = vsub.f32 %v633_v16, %v649_v19 }
 0x11a   : > { %v664_v2 = vsub.f32 %v632_v4, %v648_v38  ;;  %v674_v13 = vadd.f32 1e-05, %v658_v40  ;;  %v568_v3 = vadd.f32 %v567_v43, %v566_v28  ;;  %v839_v6 = vrot.slane %v737_v47, %v2761_v18 }
 0x11b   : > { %v736_v42 = vsub.f32 %v2773_v29, %v720_v41  ;;  %v406_v7 = vrot.slane %v405_v62, 2  ;;  %v459_v1 = vsel %vm367_vm2, %v2791_v50, 0.0  ;;  %v817_v8 = vmul.f32 %v759_v51, %v2656_v20 }
 0x11c   : > { %v755_v9 = vrot.slane %v704_v26, %v2761_v18  ;;  %v443_v10 = vrot.slane %v442_v52, 1  ;;  %v533_v11 = vadd.f32 %v532_v56, %v531_v53  ;;  %v667_v22 = vsub.f32 %v635_v57, %v651_v61 }
 0x11d   : > { %v407_v24 = vadd.f32 %v406_v7, %v405_v62  ;;  %v493_v16 = vmul.f32 %v2791_v50, %v2791_v50  ;;  %v2807_v19 = vadd.f32 %v2653_v17, %v2677_v45  ;;  %2375 = vrsqrt.f32 %v674_v13 }
 0x11e   : > { %v569_v27 = vrot.slane %v568_v3, 2  ;;  %v534_v28 = vrot.slane %v533_v11, 2  ;;  %v460_v30 = vrot.slane %v459_v1, 4  ;;  %v897_v31 = vadd.f32 %v839_v6, %v817_v8 }
 0x11f   : > { %v835_v20 = vrot.slane %v736_v42, %v2761_v18  ;;  %v408_v35 = vrot.slane %v407_v24, 1  ;;  %v681_v26 = vadd.f32 1e-05, %v665_v0  ;;  %v680_v4 = vadd.f32 1e-05, %v664_v2 }
 0x120   : > { %v444_v38 = vadd.f32 %v443_v10, %v442_v52  ;;  %v535_v33 = vadd.f32 %v534_v28, %v533_v11  ;;  %v816_v40 = vmul.f32 %v755_v9, %v2659_v23  ;;  %v587_v34 = vsel %vm367_vm2, %v493_v16, 0.0 }
 0x121   : > { %v409_v43 = vadd.f32 %v408_v35, %v407_v24  ;;  %v396_v45 = vsel %vm367_vm2, %v2807_v19, 0.0  ;;  %v683_v47 = vadd.f32 1e-05, %v667_v22  ;;  %v570_v41 = vadd.f32 %v569_v27, %v568_v3 }
 0x122   : > { %v2374_v44 = vpop.eup %2373  ;;  %v536_v48 = vrot.slane %v535_v33, 1  ;;  %v461_v51 = vadd.f32 %v460_v30, %v459_v1  ;;  %v913_v53 = vmul.f32 0.5, %v897_v31  ;;  %v896_v57 = vadd.f32 %v835_v20, %v816_v40 }
 0x123   : > { %v2814_v61 = vmul.f32 0.125, %v409_v43  ;;  %v397_v62 = vrot.slane %v396_v45, 4  ;;  %2377 = vrsqrt.f32 %v681_v26  ;;  %v2816_v52 = vmul.f32 0.125, %v444_v38 }
 0x124   : > { %v537_v23 = vadd.f32 %v536_v48, %v535_v33  ;;  %v588_v56 = vrot.slane %v587_v34, 4  ;;  %2379 = vrsqrt.f32 %v680_v4  ;;  %v707_v0 = vmul.f32 %v2374_v44, %v2748_v36 }
 0x125   : > { %v645_v2 = vmul.f32 %v2814_v61, %v2814_v61  ;;  %2381 = vrsqrt.f32 %v683_v47  ;;  %v571_v13 = vrot.slane %v570_v41, 1  ;;  %v462_v6 = vrot.slane %v461_v51, 2 }
 0x126   : > { %v629_v3 = vmul.f32 0.125, %v537_v23  ;;  %2383 = vtanh.f32 %v913_v53  ;;  %v2821_v42 = vmul.f32 0.5, %v896_v57  ;;  %v398_v7 = vadd.f32 %v397_v62, %v396_v45 }
 0x127   : > { %v2376_v1 = vpop.eup %2375  ;;  %v2825_v8 = vmul.f32 %v2816_v52, %v2816_v52  ;;  %v589_v10 = vadd.f32 %v588_v56, %v587_v34  ;;  %v484_v11 = vmul.f32 %v2807_v19, %v2807_v19  ;;  %v723_v22 = vmul.f32 %v707_v0, %v2741_v32 }
 0x128   : > { %v661_v9 = vsub.f32 %v629_v3, %v645_v2  ;;  %v767_v24 = vrot.slane %v707_v0, %v2761_v18  ;;  %v399_v16 = vrot.slane %v398_v7, 2  ;;  %v2833_v27 = vadd.f32 %v2653_v17, %v2679_v46 }
 0x129   : > { %v572_v28 = vadd.f32 %v571_v13, %v570_v41  ;;  %v463_v31 = vadd.f32 %v462_v6, %v461_v51  ;;  %v524_v20 = vsel %vm367_vm2, %v484_v11, 0.0  ;;  %v706_v35 = vmul.f32 %v2376_v1, %v2748_v36 }
 0x12a   : > { %v677_v30 = vadd.f32 1e-05, %v661_v9  ;;  %v400_v26 = vadd.f32 %v399_v16, %v398_v7  ;;  %v525_v4 = vrot.slane %v524_v20, 4  ;;  %v452_v38 = vsel %vm367_vm2, %v2833_v27, 0.0 }
 0x12b   : > { %v590_v32 = vrot.slane %v589_v10, 2  ;;  %v453_v33 = vrot.slane %v452_v38, 4  ;;  %v492_v40 = vmul.f32 %v2833_v27, %v2833_v27  ;;  %v739_v46 = vsub.f32 %v2773_v29, %v723_v22 }
 0x12c   : > { %2385 = vrsqrt.f32 %v677_v30  ;;  %v401_v43 = vrot.slane %v400_v26, 1  ;;  %v526_v34 = vadd.f32 %v525_v4, %v524_v20  ;;  %v2844_v45 = vadd.f32 %v2684_v54, %v2653_v17 }
 0x12d   : > { %v2846_v44 = vpop.eup %2377  ;;  %v819_v47 = vmul.f32 %v767_v24, %v2711_v14  ;;  %v464_v41 = vrot.slane %v463_v31, 1  ;;  %v454_v48 = vadd.f32 %v453_v33, %v452_v38  ;;  %v580_v51 = vsel %vm367_vm2, %v492_v40, 0.0 }
 0x12e   : > { %v2850_v53 = vpop.eup %2379  ;;  %v722_v57 = vmul.f32 %v706_v35, %v2759_v12  ;;  %v402_v62 = vadd.f32 %v401_v43, %v400_v26  ;;  %v527_v23 = vrot.slane %v526_v34, 2  ;;  %v581_v56 = vrot.slane %v580_v51, 4 }
 0x12f   : > { %v2853_v0 = vpop.eup %2381  ;;  %v634_v2 = vmul.f32 0.125, %v572_v28  ;;  %v591_v54 = vadd.f32 %v590_v32, %v589_v10  ;;  %v455_v13 = vrot.slane %v454_v48, 2  ;;  %v417_v3 = vsel %vm367_vm2, %v2844_v45, 0.0 }
 0x130   : > { %v2857_v14 = vpop.eup %2383  ;;  %v528_v6 = vadd.f32 %v527_v23, %v526_v34  ;;  %v2859_v7 = vmul.f32 0.125, %v402_v62  ;;  %v582_v1 = vadd.f32 %v581_v56, %v580_v51  ;;  %v2863_v12 = vadd.f32 %v2686_v55, %v2653_v17 }
 0x131   : > { %v847_v9 = vrot.slane %v739_v46, %v2761_v18  ;;  %v763_v11 = vrot.slane %v706_v35, %v2761_v18  ;;  %v465_v22 = vadd.f32 %v464_v41, %v463_v31  ;;  %v456_v10 = vadd.f32 %v455_v13, %v454_v48 }
 0x132   : > { %v738_v24 = vsub.f32 %v2773_v29, %v722_v57  ;;  %v529_v16 = vrot.slane %v528_v6, 1  ;;  %v583_v28 = vrot.slane %v582_v1, 2  ;;  %v418_v30 = vrot.slane %v417_v3, 4 }
 0x133   : > { %v592_v20 = vrot.slane %v591_v54, 1  ;;  %v644_v26 = vmul.f32 %v2859_v7, %v2859_v7  ;;  %v457_v4 = vrot.slane %v456_v10, 1  ;;  %v487_v55 = vmul.f32 %v2844_v45, %v2844_v45 }
 0x134   : > { %v530_v38 = vadd.f32 %v529_v16, %v528_v6  ;;  %v584_v32 = vadd.f32 %v583_v28, %v582_v1  ;;  %v419_v33 = vadd.f32 %v418_v30, %v417_v3  ;;  %v473_v31 = vsel %vm367_vm2, %v2863_v12, 0.0 }
 0x135   : > { %v899_v40 = vadd.f32 %v847_v9, %v819_v47  ;;  %v666_v46 = vsub.f32 %v634_v2, %v2825_v8  ;;  %v545_v43 = vsel %vm367_vm2, %v487_v55, 0.0  ;;  %v474_v34 = vrot.slane %v473_v31, 4 }
 0x136   : > { %v2386_v35 = vpop.eup %2385  ;;  %v843_v41 = vrot.slane %v738_v24, %v2761_v18  ;;  %v628_v51 = vmul.f32 0.125, %v530_v38  ;;  %v420_v57 = vrot.slane %v419_v33, 2  ;;  %v818_v62 = vmul.f32 %v763_v11, %v2722_v25 }
 0x137   : > { %v709_v48 = vmul.f32 %v2386_v35, %v2748_v36  ;;  %v2879_v23 = vmul.f32 0.125, %v465_v22  ;;  %v546_v56 = vrot.slane %v545_v43, 4  ;;  %v475_v13 = vadd.f32 %v474_v34, %v473_v31 }
 0x138   : > { %v593_v3 = vadd.f32 %v592_v20, %v591_v54  ;;  %v660_v6 = vsub.f32 %v628_v51, %v644_v26  ;;  %v458_v47 = vadd.f32 %v457_v4, %v456_v10  ;;  %v585_v1 = vrot.slane %v584_v32, 1 }
 0x139   : > { %2387 = vtanh.f32 %v2821_v42  ;;  %v682_v8 = vadd.f32 1e-05, %v666_v46  ;;  %v421_v2 = vadd.f32 %v420_v57, %v419_v33  ;;  %v547_v9 = vadd.f32 %v546_v56, %v545_v43 }
 0x13a   : > { %v915_v24 = vmul.f32 0.5, %v899_v40  ;;  %v898_v16 = vadd.f32 %v843_v41, %v818_v62  ;;  %v725_v28 = vmul.f32 %v709_v48, %v2814_v61  ;;  %v676_v30 = vadd.f32 1e-05, %v660_v6  ;;  %v976_v41 = vld [vmem:[%s3512_s1 + $0x8] sm:$0xff] }
 0x13b   : > { %v2885_v25 = vmul.f32 %v2879_v23, %v2879_v23  ;;  %v422_v11 = vrot.slane %v421_v2, 1  ;;  %v548_v22 = vrot.slane %v547_v9, 2  ;;  %v476_v54 = vrot.slane %v475_v13, 2 }
 0x13c   : > { %v2887_v20 = vmul.f32 0.125, %v593_v3  ;;  %2389 = vrsqrt.f32 %v676_v30  ;;  %v586_v10 = vadd.f32 %v585_v1, %v584_v32  ;;  %v2889_v42 = vmul.f32 0.125, %v458_v47 }
 0x13d   : > { %v423_v26 = vadd.f32 %v422_v11, %v421_v2  ;;  %v549_v4 = vadd.f32 %v548_v22, %v547_v9  ;;  %v477_v55 = vadd.f32 %v476_v54, %v475_v13  ;;  %v495_v61 = vmul.f32 %v2863_v12, %v2863_v12 }
 0x13e   : > { %v914_v38 = vmul.f32 0.5, %v898_v16  ;;  %2391 = vrsqrt.f32 %v682_v8  ;;  %v741_v33 = vsub.f32 %v2773_v29, %v725_v28  ;;  %v775_v31 = vrot.slane %v709_v48, %v2761_v18  ;;  %v977_v48 = vld [vmem:[%s3512_s1 + $0x10] sm:$0xff] }
 0x13f   : > { %v550_v35 = vrot.slane %v549_v4, 1  ;;  %v2895_v40 = vmul.f32 0.125, %v423_v26  ;;  %v601_v46 = vsel %vm367_vm2, %v495_v61, 0.0  ;;  %2393 = vtanh.f32 %v915_v24 }
 0x140   : > { %v669_v32 = vsub.f32 %v2887_v20, %v2885_v25  ;;  %v652_v43 = vmul.f32 %v2889_v42, %v2889_v42  ;;  %v478_v34 = vrot.slane %v477_v55, 1  ;;  %v636_v51 = vmul.f32 0.125, %v586_v10 }
 0x141   : > { %v551_v57 = vadd.f32 %v550_v35, %v549_v4  ;;  %v647_v62 = vmul.f32 %v2895_v40, %v2895_v40  ;;  %v602_v56 = vrot.slane %v601_v46, 4  ;;  %2395 = vtanh.f32 %v914_v38 }
 0x142   : > { %v855_v13 = vrot.slane %v741_v33, %v2761_v18  ;;  %v2913_v3 = vadd.f32 %v2653_v17, %v2691_v59  ;;  %v2917_v6 = vadd.f32 %v2653_v17, %v2693_v60  ;;  %v821_v1 = vmul.f32 %v775_v31, %v2777_v37 }
 0x143   : > { %v2919_v47 = vpop.eup %2387  ;;  %v631_v8 = vmul.f32 0.125, %v551_v57  ;;  %v603_v2 = vadd.f32 %v602_v56, %v601_v46  ;;  %v2310_v9 = vpack.c.bf16 %v977_v48, %v976_v41  ;;  %v479_v24 = vadd.f32 %v478_v34, %v477_v55 }
 0x144   : > { %v410_v16 = vsel %vm367_vm2, %v2913_v3, 0.0  ;;  %v486_v28 = vmul.f32 %v2913_v3, %v2913_v3  ;;  %v466_v59 = vsel %vm367_vm2, %v2917_v6, 0.0  ;;  %v668_v30 = vsub.f32 %v636_v51, %v652_v43 }
 0x145   : > { %v663_v17 = vsub.f32 %v631_v8, %v647_v62  ;;  %v604_v60 = vrot.slane %v603_v2, 2  ;;  %v411_v11 = vrot.slane %v410_v16, 4  ;;  %2311 = vmatprep.subr.bf16.mxu1 %v2310_v9  ;;  %v901_v37 = vadd.f32 %v855_v13, %v821_v1 }
 0x146   : > { %v2390_v22 = vpop.eup %2389  ;;  %v538_v54 = vsel %vm367_vm2, %v486_v28, 0.0  ;;  %v467_v10 = vrot.slane %v466_v59, 4  ;;  %v494_v26 = vmul.f32 %v2917_v6, %v2917_v6  ;;  %2313 = vmatpush3.bf16.msra.mxu1 %v2310_v9  ;;  %v2934_v31 = vmul.f32 0.125, %v479_v24 }
 0x147   : > { %v708_v4 = vmul.f32 %v2390_v22, %v2748_v36  ;;  %v679_v55 = vadd.f32 1e-05, %v663_v17  ;;  %v605_v61 = vadd.f32 %v604_v60, %v603_v2  ;;  %v412_v38 = vadd.f32 %v411_v11, %v410_v16 }
 0x148   : > { %v2932_v33 = vpop.eup %2391  ;;  %v539_v35 = vrot.slane %v538_v54, 4  ;;  %v468_v46 = vadd.f32 %v467_v10, %v466_v59  ;;  %v594_v43 = vsel %vm367_vm2, %v494_v26, 0.0  ;;  %v917_v1 = vmul.f32 0.5, %v901_v37 }
 0x149   : > { %v724_v34 = vmul.f32 %v708_v4, %v2859_v7  ;;  %v771_v41 = vrot.slane %v708_v4, %v2761_v18  ;;  %2397 = vrsqrt.f32 %v679_v55  ;;  %v606_v48 = vrot.slane %v605_v61, 1  ;;  %v2394_v51 = vpop.eup %2393  ;;  %v979_v4 = vld [vmem:[%s3512_s1 + $0x20] sm:$0xff] }
 0x14a   : > { %v413_v57 = vrot.slane %v412_v38, 2  ;;  %v540_v62 = vadd.f32 %v539_v35, %v538_v54  ;;  %v469_v56 = vrot.slane %v468_v46, 2  ;;  %v595_v13 = vrot.slane %v594_v43, 4 }
 0x14b   : > { %v740_v8 = vsub.f32 %v2773_v29, %v724_v34  ;;  %v684_v2 = vadd.f32 1e-05, %v668_v30  ;;  %v607_v9 = vadd.f32 %v606_v48, %v605_v61  ;;  %v2396_v24 = vpop.eup %2395  ;;  %v820_v7 = vmul.f32 %v771_v41, %v2807_v19  ;;  %v978_v30 = vld [vmem:[%s3512_s1 + $0x18] sm:$0xff] }
 0x14c   : > { %v414_v16 = vadd.f32 %v413_v57, %v412_v38  ;;  %v541_v28 = vrot.slane %v540_v62, 2  ;;  %v470_v59 = vadd.f32 %v469_v56, %v468_v46  ;;  %v596_v17 = vadd.f32 %v595_v13, %v594_v43 }
 0x14d   : > { %v851_v60 = vrot.slane %v740_v8, %v2761_v18  ;;  %v639_v11 = vmul.f32 0.125, %v607_v9  ;;  %v655_v22 = vmul.f32 %v2934_v31, %v2934_v31  ;;  %v945_v19 = vadd.f32 1.0, %v2857_v14 }
 0x14e   : > { %v415_v54 = vrot.slane %v414_v16, 1  ;;  %v542_v10 = vadd.f32 %v541_v28, %v540_v62  ;;  %v471_v37 = vrot.slane %v470_v59, 1  ;;  %v597_v26 = vrot.slane %v596_v17, 2 }
 0x14f   : > { %2399 = vtanh.f32 %v917_v1  ;;  %v685_v55 = vadd.f32 1e-05, %v669_v32  ;;  %v900_v61 = vadd.f32 %v851_v60, %v820_v7  ;;  %v671_v41 = vsub.f32 %v639_v11, %v655_v22 }
 0x150   : > { %v416_v38 = vadd.f32 %v415_v54, %v414_v16  ;;  %v543_v35 = vrot.slane %v542_v10, 1  ;;  %v472_v46 = vadd.f32 %v471_v37, %v470_v59  ;;  %v598_v43 = vadd.f32 %v597_v26, %v596_v17 }
 0x151   : > { %v916_v34 = vmul.f32 0.5, %v900_v61  ;;  %2401 = vrsqrt.f32 %v684_v2  ;;  %v2314_v48 = vpack.c.bf16 %v979_v4, %v978_v30  ;;  %v944_v25 = vadd.f32 1.0, %v2919_v47 }
 0x152   : > { %v544_v57 = vadd.f32 %v543_v35, %v542_v10  ;;  %v2954_v62 = vmul.f32 0.125, %v416_v38  ;;  %v599_v56 = vrot.slane %v598_v43, 1  ;;  %v2956_v13 = vmul.f32 0.125, %v472_v46 }
 0x153   : > { %v2398_v14 = vpop.eup %2397  ;;  %2403 = vtanh.f32 %v916_v34  ;;  %2315 = vmatprep.subr.bf16.mxu1 %v2314_v48  ;;  %v946_v20 = vadd.f32 1.0, %v2396_v24  ;;  %v712_v32 = vmul.f32 %v2850_v53, %v2748_v36  ;;  %v687_v2 = vadd.f32 1e-05, %v671_v41 }
 0x154   : > { %2405 = vrsqrt.f32 %v685_v55  ;;  %v630_v1 = vmul.f32 0.125, %v544_v57  ;;  %v646_v8 = vmul.f32 %v2954_v62, %v2954_v62  ;;  %2317 = vmatpush3.bf16.msra.mxu1 %v2314_v48  ;;  %v600_v9 = vadd.f32 %v599_v56, %v598_v43 }
 0x155   : > { %v654_v16 = vmul.f32 %v2956_v13, %v2956_v13  ;;  %v960_v28 = vmul.f32 0.5, %v944_v25  ;;  %v961_v59 = vmul.f32 0.5, %v945_v19  ;;  %v711_v17 = vmul.f32 %v2398_v14, %v2748_v36 }
 0x156   : > { %v662_v47 = vsub.f32 %v630_v1, %v646_v8  ;;  %v962_v24 = vmul.f32 0.5, %v946_v20  ;;  %v638_v7 = vmul.f32 0.125, %v600_v9  ;;  %v947_v53 = vadd.f32 1.0, %v2394_v51 }
 0x157   : > { %2254 = vmatprep.mubr.msk.f32.mxu1 %vm367_vm2, %v960_v28  ;;  %v713_v60 = vmul.f32 %v2846_v44, %v2748_v36  ;;  %v728_v11 = vmul.f32 %v712_v32, %v2757_v5  ;;  %2407 = vrsqrt.f32 %v687_v2  ;;  %v727_v37 = vmul.f32 %v711_v17, %v2895_v40 }
 0x158   : > { %v678_v22 = vadd.f32 1e-05, %v662_v47  ;;  %2255 = vmatmul.mubr.msk.f32.vlgmr.msra.gmra.mrb[8].mxu1 %vm367_vm2, %v961_v59  ;;  %v670_v10 = vsub.f32 %v638_v7, %v654_v16  ;;  %v963_v26 = vmul.f32 0.5, %v947_v53  ;;  %v714_v51 = vmul.f32 %v2932_v33, %v2748_v36 }
 0x159   : > { %v2400_v54 = vpop.eup %2399  ;;  %2257 = vmatprep.mubr.msk.f32.mxu1 %vm367_vm2, %v962_v24  ;;  %v729_v44 = vmul.f32 %v713_v60, %v2752_v63  ;;  %v744_v5 = vsub.f32 %v2773_v29, %v728_v11  ;;  %v715_v55 = vmul.f32 %v2853_v0, %v2748_v36  ;;  %v787_v38 = vrot.slane %v712_v32, %v2761_v18 }
 0x15a   : > { %2409 = vrsqrt.f32 %v678_v22  ;;  %v686_v4 = vadd.f32 1e-05, %v670_v10  ;;  %v949_v61 = vadd.f32 1.0, %v2400_v54  ;;  %v743_v35 = vsub.f32 %v2773_v29, %v727_v37 }
 0x15b   : > { %v2402_v30 = vpop.eup %2401  ;;  %v730_v33 = vmul.f32 %v714_v51, %v2816_v52  ;;  %v745_v43 = vsub.f32 %v2773_v29, %v729_v44  ;;  %v867_v34 = vrot.slane %v744_v5, %v2761_v18  ;;  %v783_v41 = vrot.slane %v711_v17, %v2761_v18 }
 0x15c   : > { %2258 = vmatmul.mubr.msk.f32.gmra.mrb[10].mxu1 %vm367_vm2, %v963_v26  ;;  %2411 = vrsqrt.f32 %v686_v4  ;;  %v716_v63 = vmul.f32 %v2402_v30, %v2748_v36  ;;  %v731_v0 = vmul.f32 %v715_v55, %v2781_v39  ;;  %v965_v57 = vmul.f32 0.5, %v949_v61 }
 0x15d   : > { %v2404_v19 = vpop.eup %2403  ;;  %v791_v56 = vrot.slane %v713_v60, %v2761_v18  ;;  %v824_v14 = vmul.f32 %v787_v38, %v2689_v58  ;;  %v863_v52 = vrot.slane %v743_v35, %v2761_v18  ;;  %v746_v32 = vsub.f32 %v2773_v29, %v730_v33 }
 0x15e   : > { %v2406_v40 = vpop.eup %2405  ;;  %v948_v46 = vadd.f32 1.0, %v2404_v19  ;;  %v732_v1 = vmul.f32 %v716_v63, %v2889_v42  ;;  %v871_v39 = vrot.slane %v745_v43, %v2761_v18  ;;  %v823_v9 = vmul.f32 %v783_v41, %v2844_v45 }
 0x15f   : > { %v717_v25 = vmul.f32 %v2406_v40, %v2748_v36  ;;  %v904_v2 = vadd.f32 %v867_v34, %v824_v14  ;;  %v747_v58 = vsub.f32 %v2773_v29, %v731_v0  ;;  %v795_v16 = vrot.slane %v714_v51, %v2761_v18 }
 0x160   : > { %v964_v48 = vmul.f32 0.5, %v948_v46  ;;  %v825_v59 = vmul.f32 %v791_v56, %v2682_v49  ;;  %v903_v47 = vadd.f32 %v863_v52, %v823_v9  ;;  %v875_v7 = vrot.slane %v746_v32, %v2761_v18 }
 0x161   : > { %v2408_v20 = vpop.eup %2407  ;;  %v733_v17 = vmul.f32 %v717_v25, %v2879_v23  ;;  %v748_v53 = vsub.f32 %v2773_v29, %v732_v1  ;;  %v920_v22 = vmul.f32 0.5, %v904_v2  ;;  %v799_v54 = vrot.slane %v715_v55, %v2761_v18 }
 0x162   : > { %2260 = vmatprep.mubr.msk.f32.mxu1 %vm367_vm2, %v964_v48  ;;  %v719_v42 = vmul.f32 %v2408_v20, %v2748_v36  ;;  %v905_v11 = vadd.f32 %v871_v39, %v825_v59  ;;  %v879_v23 = vrot.slane %v747_v58, %v2761_v18  ;;  %v826_v10 = vmul.f32 %v795_v16, %v2739_v21 }
 0x163   : > { %2261 = vmatmul.mubr.msk.f32.gmra.mrb[12].mxu1 %vm367_vm2, %v965_v57  ;;  %v803_v37 = vrot.slane %v716_v63, %v2761_v18  ;;  %v749_v30 = vsub.f32 %v2773_v29, %v733_v17  ;;  %v919_v51 = vmul.f32 0.5, %v903_v47  ;;  %v883_v5 = vrot.slane %v748_v53, %v2761_v18 }
 0x164   : > { %v2410_v8 = vpop.eup %2409  ;;  %v906_v44 = vadd.f32 %v875_v7, %v826_v10  ;;  %v921_v55 = vmul.f32 0.5, %v905_v11  ;;  %v827_v21 = vmul.f32 %v799_v54, %v2714_v15  ;;  %v807_v61 = vrot.slane %v717_v25, %v2761_v18 }
 0x165   : > { %v710_v28 = vmul.f32 %v2410_v8, %v2748_v36  ;;  %2413 = vtanh.f32 %v920_v22  ;;  %v828_v38 = vmul.f32 %v803_v37, %v2833_v27  ;;  %v887_v46 = vrot.slane %v749_v30, %v2761_v18 }
 0x166   : > { %v2412_v24 = vpop.eup %2411  ;;  %v907_v35 = vadd.f32 %v879_v23, %v827_v21  ;;  %2415 = vtanh.f32 %v919_v51  ;;  %v922_v33 = vmul.f32 0.5, %v906_v44  ;;  %v829_v34 = vmul.f32 %v807_v61, %v2791_v50 }
 0x167   : > { %v726_v45 = vmul.f32 %v710_v28, %v2954_v62  ;;  %v779_v60 = vrot.slane %v710_v28, %v2761_v18  ;;  %v718_v49 = vmul.f32 %v2412_v24, %v2748_v36  ;;  %v735_v62 = vmul.f32 %v719_v42, %v2934_v31 }
 0x168   : > { %v908_v63 = vadd.f32 %v883_v5, %v828_v38  ;;  %v815_v41 = vrot.slane %v719_v42, %v2761_v18  ;;  %v923_v48 = vmul.f32 0.5, %v907_v35  ;;  %v909_v0 = vadd.f32 %v887_v46, %v829_v34 }
 0x169   : > { %v742_v26 = vsub.f32 %v2773_v29, %v726_v45  ;;  %v734_v4 = vmul.f32 %v718_v49, %v2956_v13  ;;  %v822_v36 = vmul.f32 %v779_v60, %v2913_v3  ;;  %v811_v13 = vrot.slane %v718_v49, %v2761_v18 }
 0x16a   : > { %v751_v3 = vsub.f32 %v2773_v29, %v735_v62  ;;  %v924_v56 = vmul.f32 0.5, %v908_v63  ;;  %v831_v14 = vmul.f32 %v815_v41, %v2863_v12  ;;  %v925_v25 = vmul.f32 0.5, %v909_v0  ;;  %v3046_v62 = vld [vmem:[%s3512_s1 + $0x4b] ss:$0 sm:$0xff] }
 0x16b   : > { %v859_v19 = vrot.slane %v742_v26, %v2761_v18  ;;  %v750_v40 = vsub.f32 %v2773_v29, %v734_v4  ;;  %v830_v27 = vmul.f32 %v811_v13, %v2917_v6 }
 0x16c   : > { %v895_v57 = vrot.slane %v751_v3, %v2761_v18 }
 0x16d   : > { %v902_v31 = vadd.f32 %v859_v19, %v822_v36  ;;  %v891_v15 = vrot.slane %v750_v40, %v2761_v18 }
 0x16e   : > { %v911_v52 = vadd.f32 %v895_v57, %v831_v14 }
 0x16f   : > { %v918_v43 = vmul.f32 0.5, %v902_v31  ;;  %v910_v29 = vadd.f32 %v891_v15, %v830_v27  ;;  %v2414_v20 = vpop.eup %2413 }
 0x170   : > { %v2416_v32 = vpop.eup %2415  ;;  %v927_v1 = vmul.f32 0.5, %v911_v52  ;;  %v952_v9 = vadd.f32 1.0, %v2414_v20 }
 0x171   : > { %2417 = vtanh.f32 %v918_v43  ;;  %v926_v50 = vmul.f32 0.5, %v910_v29  ;;  %v951_v8 = vadd.f32 1.0, %v2416_v32 }
 0x172   : > { %2419 = vtanh.f32 %v921_v55  ;;  %v968_v17 = vmul.f32 0.5, %v952_v9 }
 0x173   : > { %2421 = vtanh.f32 %v922_v33  ;;  %v967_v28 = vmul.f32 0.5, %v951_v8 }
 0x174   : > { %2423 = vtanh.f32 %v923_v48 }
 0x175   : > { %2425 = vtanh.f32 %v924_v56 }
 0x176   : > { %2427 = vtanh.f32 %v925_v25 }
 0x177   : > { %2429 = vtanh.f32 %v926_v50 }
 0x178   : > { %2431 = vtanh.f32 %v927_v1 }
 0x17b   : > { %v2418_v6 = vpop.eup %2417 }
 0x17c   : > { %v2420_v39 = vpop.eup %2419  ;;  %v950_v2 = vadd.f32 1.0, %v2418_v6 }
 0x17d   : > { %v2422_v58 = vpop.eup %2421  ;;  %v953_v12 = vadd.f32 1.0, %v2420_v39 }
 0x17e   : > { %v966_v16 = vmul.f32 0.5, %v950_v2  ;;  %v2424_v59 = vpop.eup %2423  ;;  %v954_v47 = vadd.f32 1.0, %v2422_v58 }
 0x17f   : > { %v2426_v42 = vpop.eup %2425  ;;  %v969_v24 = vmul.f32 0.5, %v953_v12  ;;  %v955_v7 = vadd.f32 1.0, %v2424_v59 }
 0x180   : > { %2263 = vmatprep.mubr.msk.f32.mxu1 %vm367_vm2, %v966_v16  ;;  %v2428_v53 = vpop.eup %2427  ;;  %v970_v45 = vmul.f32 0.5, %v954_v47  ;;  %v956_v60 = vadd.f32 1.0, %v2426_v42 }
 0x181   : > { %2264 = vmatmul.mubr.msk.f32.gmra.mrb[14].mxu1 %vm367_vm2, %v967_v28  ;;  %v2430_v11 = vpop.eup %2429  ;;  %v971_v22 = vmul.f32 0.5, %v955_v7  ;;  %v957_v54 = vadd.f32 1.0, %v2428_v53 }
 0x182   : > { %2266 = vmatprep.mubr.msk.f32.mxu1 %vm367_vm2, %v968_v17  ;;  %v2432_v49 = vpop.eup %2431  ;;  %v972_v23 = vmul.f32 0.5, %v956_v60  ;;  %v958_v10 = vadd.f32 1.0, %v2430_v11 }
 0x183   : > { %v973_v37 = vmul.f32 0.5, %v957_v54  ;;  %v959_v26 = vadd.f32 1.0, %v2432_v49 }
 0x184   : > { %v974_v30 = vmul.f32 0.5, %v958_v10 }
 0x185   : > { %2267 = vmatmul.mubr.msk.f32.gmra.mrb[16].mxu1 %vm367_vm2, %v969_v24  ;;  %v975_v51 = vmul.f32 0.5, %v959_v26 }
 0x186   : > { %2269 = vmatprep.mubr.msk.f32.mxu1 %vm367_vm2, %v970_v45 }
 0x189   : > { %2270 = vmatmul.mubr.msk.f32.gmra.mrb[18].mxu1 %vm367_vm2, %v971_v22 }
 0x18a   : > { %2272 = vmatprep.mubr.msk.f32.mxu1 %vm367_vm2, %v972_v23 }
 0x18d   : > { %2273 = vmatmul.mubr.msk.f32.gmra.mrb[20].mxu1 %vm367_vm2, %v973_v37 }
 0x18e   : > { %2275 = vmatprep.mubr.msk.f32.mxu1 %vm367_vm2, %v974_v30 }
 0x191   : > { %2276 = vmatmul.mubr.msk.f32.gmra.mrb[22].mxu1 %vm367_vm2, %v975_v51 }
 0x22b   : > { %v2256_v4 = vpop.f32.mrb[8].mxu1 }
 0x22c   : > { %v3049_v44 = vadd.f32 %v2256_v4, %v3046_v62  ;;  %v1101_v5 = vpop.f32.mrb[9].mxu1 }
 0x22d   : > { %v3052_v36 = vadd.f32 %v3046_v62, %v1101_v5 }
 0x22e   : > { %v1187_v19 = vsel %vm367_vm2, %v3049_v44, 0.0  ;;  %v1293_v55 = vmul.f32 %v3049_v44, %v3049_v44 }
 0x22f   : > { %v1188_v21 = vrot.slane %v1187_v19, 4  ;;  %v1180_v61 = vsel %vm367_vm2, %v3052_v36, 0.0  ;;  %v1292_v40 = vmul.f32 %v3052_v36, %v3052_v36  ;;  %v2259_v38 = vpop.f32.mrb[10].mxu1 }
 0x230   : > { %v1315_v31 = vsel %vm367_vm2, %v1293_v55, 0.0  ;;  %v1181_v13 = vrot.slane %v1180_v61, 4  ;;  %v3064_v35 = vadd.f32 %v2259_v38, %v3046_v62  ;;  %v1111_v46 = vpop.f32.mrb[11].mxu1 }
 0x231   : > { %v1189_v3 = vadd.f32 %v1188_v21, %v1187_v19  ;;  %v1316_v33 = vrot.slane %v1315_v31, 4  ;;  %v1308_v63 = vsel %vm367_vm2, %v1292_v40, 0.0  ;;  %v3068_v43 = vadd.f32 %v3046_v62, %v1111_v46 }
 0x232   : > { %v1182_v15 = vadd.f32 %v1181_v13, %v1180_v61  ;;  %v1309_v34 = vrot.slane %v1308_v63, 4  ;;  %v1201_v41 = vsel %vm367_vm2, %v3064_v35, 0.0  ;;  %v1295_v27 = vmul.f32 %v3064_v35, %v3064_v35 }
 0x233   : > { %v1190_v48 = vrot.slane %v1189_v3, 2  ;;  %v1317_v0 = vadd.f32 %v1316_v33, %v1315_v31  ;;  %v1202_v57 = vrot.slane %v1201_v41, 4  ;;  %v1194_v56 = vsel %vm367_vm2, %v3068_v43, 0.0 }
 0x234   : > { %v1183_v29 = vrot.slane %v1182_v15, 2  ;;  %v1310_v14 = vadd.f32 %v1309_v34, %v1308_v63  ;;  %v1329_v25 = vsel %vm367_vm2, %v1295_v27, 0.0  ;;  %v1195_v52 = vrot.slane %v1194_v56, 4 }
 0x235   : > { %v1191_v20 = vadd.f32 %v1190_v48, %v1189_v3  ;;  %v1318_v50 = vrot.slane %v1317_v0, 2  ;;  %v1203_v32 = vadd.f32 %v1202_v57, %v1201_v41  ;;  %v1330_v1 = vrot.slane %v1329_v25, 4 }
 0x236   : > { %v1184_v6 = vadd.f32 %v1183_v29, %v1182_v15  ;;  %v1311_v8 = vrot.slane %v1310_v14, 2  ;;  %v1196_v39 = vadd.f32 %v1195_v52, %v1194_v56  ;;  %v1294_v2 = vmul.f32 %v3068_v43, %v3068_v43  ;;  %v2262_v9 = vpop.f32.mrb[12].mxu1 }
 0x237   : > { %v1192_v58 = vrot.slane %v1191_v20, 1  ;;  %v1319_v16 = vadd.f32 %v1318_v50, %v1317_v0  ;;  %v1204_v28 = vrot.slane %v1203_v32, 2  ;;  %v1331_v12 = vadd.f32 %v1330_v1, %v1329_v25  ;;  %v1121_v59 = vpop.f32.mrb[13].mxu1  ;;  %v1789_v50 = vld [vmem:[%s3512_s1 + $0x30] sm:$0xff] }
 0x238   : > { %v1185_v17 = vrot.slane %v1184_v6, 1  ;;  %v1312_v47 = vadd.f32 %v1311_v8, %v1310_v14  ;;  %v1197_v42 = vrot.slane %v1196_v39, 2  ;;  %v1322_v24 = vsel %vm367_vm2, %v1294_v2, 0.0 }
 0x239   : > { %v1193_v7 = vadd.f32 %v1192_v58, %v1191_v20  ;;  %v1320_v53 = vrot.slane %v1319_v16, 1  ;;  %v1205_v45 = vadd.f32 %v1204_v28, %v1203_v32  ;;  %v1332_v60 = vrot.slane %v1331_v12, 2  ;;  %v1788_v20 = vld [vmem:[%s3512_s1 + $0x28] sm:$0xff]  ;;  %v1791_v58 = vld [vmem:[%s3512_s1 + $0x40] sm:$0xff] }
 0x23a   : > { %v1186_v11 = vadd.f32 %v1185_v17, %v1184_v6  ;;  %v1313_v22 = vrot.slane %v1312_v47, 1  ;;  %v1198_v54 = vadd.f32 %v1197_v42, %v1196_v39  ;;  %v1323_v49 = vrot.slane %v1322_v24, 4 }
 0x23b   : > { %v1321_v23 = vadd.f32 %v1320_v53, %v1319_v16  ;;  %v3080_v10 = vmul.f32 0.125, %v1193_v7  ;;  %v1206_v37 = vrot.slane %v1205_v45, 1  ;;  %v1333_v26 = vadd.f32 %v1332_v60, %v1331_v12 }
 0x23c   : > { %v1314_v30 = vadd.f32 %v1313_v22, %v1312_v47  ;;  %v3082_v51 = vmul.f32 0.125, %v1186_v11  ;;  %v1199_v4 = vrot.slane %v1198_v54, 1  ;;  %v1324_v5 = vadd.f32 %v1323_v49, %v1322_v24 }
 0x23d   : > { %v1437_v19 = vmul.f32 0.125, %v1321_v23  ;;  %v1453_v55 = vmul.f32 %v3080_v10, %v3080_v10  ;;  %v1207_v21 = vadd.f32 %v1206_v37, %v1205_v45  ;;  %v1334_v61 = vrot.slane %v1333_v26, 1 }
 0x23e   : > { %v1436_v40 = vmul.f32 0.125, %v1314_v30  ;;  %v1452_v38 = vmul.f32 %v3082_v51, %v3082_v51  ;;  %v1200_v31 = vadd.f32 %v1199_v4, %v1198_v54  ;;  %v1325_v13 = vrot.slane %v1324_v5, 2  ;;  %v3127_v30 = vld [vmem:[%s3512_s1 + $0x4c] sm:$0x1] }
 0x23f   : > { %v1469_v46 = vsub.f32 %v1437_v19, %v1453_v55  ;;  %v1335_v3 = vadd.f32 %v1334_v61, %v1333_v26  ;;  %v3088_v33 = vmul.f32 0.125, %v1207_v21  ;;  %v3091_v63 = vadd.f32 %v2262_v9, %v3046_v62  ;;  %v1790_v9 = vld [vmem:[%s3512_s1 + $0x38] sm:$0xff] }
 0x240   : > { %v1468_v15 = vsub.f32 %v1436_v40, %v1452_v38  ;;  %v1326_v34 = vadd.f32 %v1325_v13, %v1324_v5  ;;  %v3093_v41 = vmul.f32 0.125, %v1200_v31  ;;  %v3096_v27 = vadd.f32 %v3046_v62, %v1121_v59 }
 0x241   : > { %v1485_v48 = vadd.f32 1e-05, %v1469_v46  ;;  %v1439_v0 = vmul.f32 0.125, %v1335_v3  ;;  %v1455_v57 = vmul.f32 %v3088_v33, %v3088_v33  ;;  %v1215_v56 = vsel %vm367_vm2, %v3091_v63, 0.0  ;;  %v3135_v3 = vld [vmem:[%s3512_s1 + $0x4d] sm:$0x1] }
 0x242   : > { %v1484_v29 = vadd.f32 1e-05, %v1468_v15  ;;  %v1327_v14 = vrot.slane %v1326_v34, 1  ;;  %v1454_v25 = vmul.f32 %v3093_v41, %v3093_v41  ;;  %v1216_v52 = vrot.slane %v1215_v56, 4 }
 0x243   : > { %2433 = vrsqrt.f32 %v1485_v48  ;;  %v1471_v32 = vsub.f32 %v1439_v0, %v1455_v57  ;;  %v1297_v1 = vmul.f32 %v3091_v63, %v3091_v63  ;;  %v1208_v6 = vsel %vm367_vm2, %v3096_v27, 0.0 }
 0x244   : > { %2435 = vrsqrt.f32 %v1484_v29  ;;  %v1328_v8 = vadd.f32 %v1327_v14, %v1326_v34  ;;  %v1217_v39 = vadd.f32 %v1216_v52, %v1215_v56  ;;  %v1209_v2 = vrot.slane %v1208_v6, 4 }
 0x245   : > { %v1487_v16 = vadd.f32 1e-05, %v1471_v32  ;;  %v1343_v28 = vsel %vm367_vm2, %v1297_v1, 0.0  ;;  %v1296_v12 = vmul.f32 %v3096_v27, %v3096_v27  ;;  %v2318_v59 = vpack.c.bf16 %v1789_v50, %v1788_v20 }
 0x246   : > { %v1438_v17 = vmul.f32 0.125, %v1328_v8  ;;  %v1218_v47 = vrot.slane %v1217_v39, 2  ;;  %v1344_v42 = vrot.slane %v1343_v28, 4  ;;  %v1210_v24 = vadd.f32 %v1209_v2, %v1208_v6 }
 0x247   : > { %2437 = vrsqrt.f32 %v1487_v16  ;;  %v1336_v7 = vsel %vm367_vm2, %v1296_v12, 0.0  ;;  %2319 = vmatprep.subr.bf16.mxu0 %v2318_v59  ;;  %v2322_v53 = vpack.c.bf16 %v1791_v58, %v1790_v9 }
 0x248   : > { %v1470_v45 = vsub.f32 %v1438_v17, %v1454_v25  ;;  %v1219_v60 = vadd.f32 %v1218_v47, %v1217_v39  ;;  %v1345_v11 = vadd.f32 %v1344_v42, %v1343_v28  ;;  %v1211_v22 = vrot.slane %v1210_v24, 2  ;;  %2321 = vmatpush3.bf16.msra.mxu0 %v2318_v59 }
 0x249   : > { %v1337_v54 = vrot.slane %v1336_v7, 4  ;;  %2323 = vmatprep.subr.bf16.mxu0 %v2322_v53 }
 0x24a   : > { %v1486_v49 = vadd.f32 1e-05, %v1470_v45  ;;  %v1220_v23 = vrot.slane %v1219_v60, 1  ;;  %v1346_v37 = vrot.slane %v1345_v11, 2  ;;  %v1212_v26 = vadd.f32 %v1211_v22, %v1210_v24 }
 0x24b   : > { %v1338_v4 = vadd.f32 %v1337_v54, %v1336_v7 }
 0x24c   : > { %2439 = vrsqrt.f32 %v1486_v49  ;;  %v1221_v5 = vadd.f32 %v1220_v23, %v1219_v60  ;;  %v1347_v19 = vadd.f32 %v1346_v37, %v1345_v11  ;;  %v1213_v55 = vrot.slane %v1212_v26, 1  ;;  %2325 = vmatpush3.bf16.msra.mxu0 %v2322_v53 }
 0x24d   : > { %v2434_v21 = vpop.eup %2433  ;;  %v1339_v61 = vrot.slane %v1338_v4, 2 }
 0x24e   : > { %v2436_v40 = vpop.eup %2435  ;;  %v1517_v38 = vmul.f32 %v2434_v21, %v3127_v30  ;;  %v1348_v31 = vrot.slane %v1347_v19, 1  ;;  %v3130_v13 = vmul.f32 0.125, %v1221_v5  ;;  %v1214_v46 = vadd.f32 %v1213_v55, %v1212_v26 }
 0x24f   : > { %v1516_v15 = vmul.f32 %v2436_v40, %v3127_v30  ;;  %v1340_v34 = vadd.f32 %v1339_v61, %v1338_v4 }
 0x250   : > { %v1533_v48 = vmul.f32 %v1517_v38, %v3080_v10  ;;  %v1571_v0 = vrot.slane %v1517_v38, %v2761_v18  ;;  %v1349_v57 = vadd.f32 %v1348_v31, %v1347_v19  ;;  %v1457_v56 = vmul.f32 %v3130_v13, %v3130_v13 }
 0x251   : > { %v2438_v29 = vpop.eup %2437  ;;  %v1532_v14 = vmul.f32 %v1516_v15, %v3082_v51  ;;  %v1567_v25 = vrot.slane %v1516_v15, %v2761_v18  ;;  %v1341_v52 = vrot.slane %v1340_v34, 1  ;;  %v3144_v20 = vmul.f32 0.125, %v1214_v46 }
 0x252   : > { %v1549_v50 = vsub.f32 %v3135_v3, %v1533_v48  ;;  %v1519_v32 = vmul.f32 %v2438_v29, %v3127_v30  ;;  %v1441_v1 = vmul.f32 0.125, %v1349_v57  ;;  %v1629_v10 = vmul.f32 %v1571_v0, %v3049_v44 }
 0x253   : > { %v1548_v6 = vsub.f32 %v3135_v3, %v1532_v14  ;;  %v1342_v8 = vadd.f32 %v1341_v52, %v1340_v34  ;;  %v1456_v39 = vmul.f32 %v3144_v20, %v3144_v20  ;;  %v1628_v28 = vmul.f32 %v1567_v25, %v3052_v36 }
 0x254   : > { %v1651_v51 = vrot.slane %v1549_v50, %v2761_v18  ;;  %v1535_v2 = vmul.f32 %v1519_v32, %v3088_v33  ;;  %v1579_v9 = vrot.slane %v1519_v32, %v2761_v18  ;;  %v1473_v58 = vsub.f32 %v1441_v1, %v1457_v56  ;;  %v2265_v16 = vpop.f32.mrb[14].mxu1 }
 0x255   : > { %v1647_v12 = vrot.slane %v1548_v6, %v2761_v18  ;;  %v1440_v59 = vmul.f32 0.125, %v1342_v8  ;;  %v3158_v44 = vadd.f32 %v2265_v16, %v3046_v62  ;;  %v1131_v17 = vpop.f32.mrb[15].mxu1 }
 0x256   : > { %v2440_v47 = vpop.eup %2439  ;;  %v1709_v42 = vadd.f32 %v1651_v51, %v1629_v10  ;;  %v1551_v24 = vsub.f32 %v3135_v3, %v1535_v2  ;;  %v1631_v7 = vmul.f32 %v1579_v9, %v3064_v35  ;;  %v1489_v33 = vadd.f32 1e-05, %v1473_v58 }
 0x257   : > { %v1708_v53 = vadd.f32 %v1647_v12, %v1628_v28  ;;  %v1518_v45 = vmul.f32 %v2440_v47, %v3127_v30  ;;  %v1472_v60 = vsub.f32 %v1440_v59, %v1456_v39  ;;  %v1229_v36 = vsel %vm367_vm2, %v3158_v44, 0.0 }
 0x258   : > { %v1725_v11 = vmul.f32 0.5, %v1709_v42  ;;  %v1659_v22 = vrot.slane %v1551_v24, %v2761_v18  ;;  %2441 = vrsqrt.f32 %v1489_v33  ;;  %v1230_v54 = vrot.slane %v1229_v36, 4  ;;  %v2268_v49 = vpop.f32.mrb[16].mxu1 }
 0x259   : > { %v1724_v23 = vmul.f32 0.5, %v1708_v53  ;;  %v1534_v37 = vmul.f32 %v1518_v45, %v3093_v41  ;;  %v1575_v26 = vrot.slane %v1518_v45, %v2761_v18  ;;  %v1488_v35 = vadd.f32 1e-05, %v1472_v60  ;;  %v1141_v4 = vpop.f32.mrb[17].mxu1 }
 0x25a   : > { %2443 = vtanh.f32 %v1725_v11  ;;  %v1711_v5 = vadd.f32 %v1659_v22, %v1631_v7  ;;  %v1231_v19 = vadd.f32 %v1230_v54, %v1229_v36  ;;  %v1299_v55 = vmul.f32 %v3158_v44, %v3158_v44 }
 0x25b   : > { %2445 = vtanh.f32 %v1724_v23  ;;  %v1550_v21 = vsub.f32 %v3135_v3, %v1534_v37  ;;  %v1630_v61 = vmul.f32 %v1575_v26, %v3068_v43  ;;  %v3173_v40 = vadd.f32 %v3046_v62, %v1131_v17 }
 0x25c   : > { %v1727_v38 = vmul.f32 0.5, %v1711_v5  ;;  %2447 = vrsqrt.f32 %v1488_v35  ;;  %v1232_v41 = vrot.slane %v1231_v19, 2  ;;  %v1357_v31 = vsel %vm367_vm2, %v1299_v55, 0.0  ;;  %v3176_v46 = vpop.f32.mrb[18].mxu1 }
 0x25d   : > { %v1655_v15 = vrot.slane %v1550_v21, %v2761_v18  ;;  %v1358_v34 = vrot.slane %v1357_v31, 4  ;;  %v1222_v48 = vsel %vm367_vm2, %v3173_v40, 0.0  ;;  %v1298_v0 = vmul.f32 %v3173_v40, %v3173_v40  ;;  %v3183_v43 = vpop.f32.mrb[19].mxu1 }
 0x25e   : > { %2449 = vtanh.f32 %v1727_v38  ;;  %v1233_v57 = vadd.f32 %v1232_v41, %v1231_v19  ;;  %v1223_v56 = vrot.slane %v1222_v48, 4  ;;  %v3186_v29 = vadd.f32 %v2268_v49, %v3046_v62 }
 0x25f   : > { %v1710_v14 = vadd.f32 %v1655_v15, %v1630_v61  ;;  %v1359_v25 = vadd.f32 %v1358_v34, %v1357_v31  ;;  %v1350_v52 = vsel %vm367_vm2, %v1298_v0, 0.0  ;;  %v3190_v50 = vadd.f32 %v3046_v62, %v1141_v4 }
 0x260   : > { %v1234_v32 = vrot.slane %v1233_v57, 1  ;;  %v1224_v1 = vadd.f32 %v1223_v56, %v1222_v48  ;;  %v1351_v10 = vrot.slane %v1350_v52, 4  ;;  %v1243_v6 = vsel %vm367_vm2, %v3186_v29, 0.0  ;;  %v3194_v8 = vpop.f32.mrb[20].mxu1 }
 0x261   : > { %v1726_v39 = vmul.f32 0.5, %v1710_v14  ;;  %v1360_v51 = vrot.slane %v1359_v25, 2  ;;  %v1244_v2 = vrot.slane %v1243_v6, 4  ;;  %v1301_v9 = vmul.f32 %v3186_v29, %v3186_v29  ;;  %v3198_v58 = vpop.f32.mrb[21].mxu1 }
 0x262   : > { %v2442_v16 = vpop.eup %2441  ;;  %v1235_v28 = vadd.f32 %v1234_v32, %v1233_v57  ;;  %v1225_v12 = vrot.slane %v1224_v1, 2  ;;  %v1352_v59 = vadd.f32 %v1351_v10, %v1350_v52  ;;  %v1236_v17 = vsel %vm367_vm2, %v3190_v50, 0.0 }
 0x263   : > { %2451 = vtanh.f32 %v1726_v39  ;;  %v1521_v47 = vmul.f32 %v2442_v16, %v3127_v30  ;;  %v1361_v42 = vadd.f32 %v1360_v51, %v1359_v25  ;;  %v1245_v24 = vadd.f32 %v1244_v2, %v1243_v6 }
 0x264   : > { %v2444_v7 = vpop.eup %2443  ;;  %v3203_v33 = vmul.f32 0.125, %v1235_v28  ;;  %v1226_v53 = vadd.f32 %v1225_v12, %v1224_v1  ;;  %v1353_v45 = vrot.slane %v1352_v59, 2  ;;  %v1371_v60 = vsel %vm367_vm2, %v1301_v9, 0.0  ;;  %v3206_v36 = vpop.f32.mrb[22].mxu1 }
 0x265   : > { %v3208_v11 = vpop.eup %2445  ;;  %v1757_v22 = vadd.f32 1.0, %v2444_v7  ;;  %v1537_v54 = vmul.f32 %v1521_v47, %v3130_v13  ;;  %v1587_v49 = vrot.slane %v1521_v47, %v2761_v18  ;;  %v1362_v23 = vrot.slane %v1361_v42, 1  ;;  %v3212_v37 = vpop.f32.mrb[23].mxu1 }
 0x266   : > { %v2448_v26 = vpop.eup %2447  ;;  %v1459_v35 = vmul.f32 %v3203_v33, %v3203_v33  ;;  %v1227_v4 = vrot.slane %v1226_v53, 1  ;;  %v1354_v5 = vadd.f32 %v1353_v45, %v1352_v59  ;;  %v1246_v19 = vrot.slane %v1245_v24, 2 }
 0x267   : > { %v3216_v55 = vmul.f32 0.5, %v1757_v22  ;;  %v1553_v21 = vsub.f32 %v3135_v3, %v1537_v54  ;;  %v1633_v61 = vmul.f32 %v1587_v49, %v3091_v63  ;;  %v1520_v13 = vmul.f32 %v2448_v26, %v3127_v30 }
 0x268   : > { %v3221_v38 = vpop.eup %2449  ;;  %v1363_v41 = vadd.f32 %v1362_v23, %v1361_v42  ;;  %v1228_v31 = vadd.f32 %v1227_v4, %v1226_v53  ;;  %v1355_v15 = vrot.slane %v1354_v5, 1  ;;  %v1247_v34 = vadd.f32 %v1246_v19, %v1245_v24 }
 0x269   : > { %v1667_v48 = vrot.slane %v1553_v21, %v2761_v18  ;;  %v1536_v0 = vmul.f32 %v1520_v13, %v3144_v20  ;;  %v1583_v57 = vrot.slane %v1520_v13, %v2761_v18  ;;  %v1372_v56 = vrot.slane %v1371_v60, 4 }
 0x26a   : > { %v1443_v14 = vmul.f32 0.125, %v1363_v41  ;;  %v1356_v25 = vadd.f32 %v1355_v15, %v1354_v5  ;;  %v3226_v52 = vmul.f32 0.125, %v1228_v31  ;;  %v1248_v63 = vrot.slane %v1247_v34, 1 }
 0x26b   : > { %v1713_v32 = vadd.f32 %v1667_v48, %v1633_v61  ;;  %v1552_v1 = vsub.f32 %v3135_v3, %v1536_v0  ;;  %v1632_v10 = vmul.f32 %v1583_v57, %v3096_v27  ;;  %v1373_v6 = vadd.f32 %v1372_v56, %v1371_v60 }
 0x26c   : > { %v1475_v39 = vsub.f32 %v1443_v14, %v1459_v35  ;;  %v1442_v51 = vmul.f32 0.125, %v1356_v25  ;;  %v1458_v2 = vmul.f32 %v3226_v52, %v3226_v52  ;;  %v1249_v20 = vadd.f32 %v1248_v63, %v1247_v34 }
 0x26d   : > { %v3232_v9 = vpop.eup %2451  ;;  %v1729_v16 = vmul.f32 0.5, %v1713_v32  ;;  %v1663_v28 = vrot.slane %v1552_v1, %v2761_v18  ;;  %v1374_v12 = vrot.slane %v1373_v6, 2  ;;  %v1237_v59 = vrot.slane %v1236_v17, 4 }
 0x26e   : > { %v1491_v47 = vadd.f32 1e-05, %v1475_v39  ;;  %v1474_v42 = vsub.f32 %v1442_v51, %v1458_v2  ;;  %v3235_v24 = vmul.f32 0.125, %v1249_v20  ;;  %v1300_v27 = vmul.f32 %v3190_v50, %v3190_v50 }
 0x26f   : > { %2453 = vtanh.f32 %v1729_v16  ;;  %v1712_v7 = vadd.f32 %v1663_v28, %v1632_v10  ;;  %v1375_v53 = vadd.f32 %v1374_v12, %v1373_v6  ;;  %v1238_v45 = vadd.f32 %v1237_v59, %v1236_v17 }
 0x270   : > { %2455 = vrsqrt.f32 %v1491_v47  ;;  %v1490_v60 = vadd.f32 1e-05, %v1474_v42  ;;  %v1461_v22 = vmul.f32 %v3235_v24, %v3235_v24  ;;  %v1364_v54 = vsel %vm367_vm2, %v1300_v27, 0.0 }
 0x271   : > { %v1728_v49 = vmul.f32 0.5, %v1712_v7  ;;  %v1376_v23 = vrot.slane %v1375_v53, 1  ;;  %v1239_v26 = vrot.slane %v1238_v45, 2  ;;  %v1365_v35 = vrot.slane %v1364_v54, 4 }
 0x272   : > { %2457 = vrsqrt.f32 %v1490_v60  ;;  %v3244_v4 = vadd.f32 %v3176_v46, %v3046_v62  ;;  %v3248_v5 = vadd.f32 %v3046_v62, %v3183_v43  ;;  %v3252_v17 = vadd.f32 %v3194_v8, %v3046_v62 }
 0x273   : > { %2459 = vtanh.f32 %v1728_v49  ;;  %v1377_v19 = vadd.f32 %v1376_v23, %v1375_v53  ;;  %v1240_v21 = vadd.f32 %v1239_v26, %v1238_v45  ;;  %v1366_v61 = vadd.f32 %v1365_v35, %v1364_v54 }
 0x274   : > { %v1257_v13 = vsel %vm367_vm2, %v3244_v4, 0.0  ;;  %v1303_v41 = vmul.f32 %v3244_v4, %v3244_v4  ;;  %v1250_v46 = vsel %vm367_vm2, %v3248_v5, 0.0  ;;  %v1302_v43 = vmul.f32 %v3248_v5, %v3248_v5 }
 0x275   : > { %v1445_v31 = vmul.f32 0.125, %v1377_v19  ;;  %v1241_v15 = vrot.slane %v1240_v21, 1  ;;  %v1367_v8 = vrot.slane %v1366_v61, 2  ;;  %v1258_v34 = vrot.slane %v1257_v13, 4 }
 0x276   : > { %v1385_v48 = vsel %vm367_vm2, %v1303_v41, 0.0  ;;  %v1251_v0 = vrot.slane %v1250_v46, 4  ;;  %v1378_v57 = vsel %vm367_vm2, %v1302_v43, 0.0  ;;  %v1271_v56 = vsel %vm367_vm2, %v3252_v17, 0.0 }
 0x277   : > { %v1477_v14 = vsub.f32 %v1445_v31, %v1461_v22  ;;  %v1242_v25 = vadd.f32 %v1241_v15, %v1240_v21  ;;  %v1368_v63 = vadd.f32 %v1367_v8, %v1366_v61  ;;  %v1259_v32 = vadd.f32 %v1258_v34, %v1257_v13 }
 0x278   : > { %v1386_v1 = vrot.slane %v1385_v48, 4  ;;  %v1252_v10 = vadd.f32 %v1251_v0, %v1250_v46  ;;  %v1379_v6 = vrot.slane %v1378_v57, 4  ;;  %v1272_v39 = vrot.slane %v1271_v56, 4 }
 0x279   : > { %v3266_v51 = vpop.eup %2453  ;;  %v1493_v2 = vadd.f32 1e-05, %v1477_v14  ;;  %v1369_v20 = vrot.slane %v1368_v63, 1  ;;  %v3268_v16 = vmul.f32 0.125, %v1242_v25  ;;  %v1260_v28 = vrot.slane %v1259_v32, 2 }
 0x27a   : > { %v2456_v12 = vpop.eup %2455  ;;  %v1387_v59 = vadd.f32 %v1386_v1, %v1385_v48  ;;  %v1253_v47 = vrot.slane %v1252_v10, 2  ;;  %v1380_v42 = vadd.f32 %v1379_v6, %v1378_v57  ;;  %v1273_v27 = vadd.f32 %v1272_v39, %v1271_v56 }
 0x27b   : > { %v1523_v7 = vmul.f32 %v2456_v12, %v3127_v30  ;;  %2461 = vrsqrt.f32 %v1493_v2  ;;  %v1370_v53 = vadd.f32 %v1369_v20, %v1368_v63  ;;  %v1460_v45 = vmul.f32 %v3268_v16, %v3268_v16 }
 0x27c   : > { %v2458_v60 = vpop.eup %2457  ;;  %v1261_v22 = vadd.f32 %v1260_v28, %v1259_v32  ;;  %v1388_v54 = vrot.slane %v1387_v59, 2  ;;  %v1254_v49 = vadd.f32 %v1253_v47, %v1252_v10  ;;  %v1381_v23 = vrot.slane %v1380_v42, 2 }
 0x27d   : > { %v3273_v26 = vpop.eup %2459  ;;  %v1539_v35 = vmul.f32 %v1523_v7, %v3203_v33  ;;  %v1595_v19 = vrot.slane %v1523_v7, %v2761_v18  ;;  %v1522_v21 = vmul.f32 %v2458_v60, %v3127_v30  ;;  %v1444_v61 = vmul.f32 0.125, %v1370_v53 }
 0x27e   : > { %v1262_v13 = vrot.slane %v1261_v22, 1  ;;  %v1389_v41 = vadd.f32 %v1388_v54, %v1387_v59  ;;  %v1255_v46 = vrot.slane %v1254_v49, 1  ;;  %v1382_v43 = vadd.f32 %v1381_v23, %v1380_v42 }
 0x27f   : > { %v1555_v31 = vsub.f32 %v3135_v3, %v1539_v35  ;;  %v1635_v15 = vmul.f32 %v1595_v19, %v3158_v44  ;;  %v1538_v8 = vmul.f32 %v1522_v21, %v3226_v52  ;;  %v1591_v34 = vrot.slane %v1522_v21, %v2761_v18 }
 0x280   : > { %v1476_v48 = vsub.f32 %v1444_v61, %v1460_v45  ;;  %v1263_v0 = vadd.f32 %v1262_v13, %v1261_v22  ;;  %v1390_v33 = vrot.slane %v1389_v41, 1  ;;  %v1256_v57 = vadd.f32 %v1255_v46, %v1254_v49 }
 0x281   : > { %v1675_v56 = vrot.slane %v1555_v31, %v2761_v18  ;;  %v1554_v14 = vsub.f32 %v3135_v3, %v1538_v8  ;;  %v1634_v25 = vmul.f32 %v1591_v34, %v3173_v40  ;;  %v1383_v63 = vrot.slane %v1382_v43, 1 }
 0x282   : > { %v1492_v32 = vadd.f32 1e-05, %v1476_v48  ;;  %v1391_v1 = vadd.f32 %v1390_v33, %v1389_v41  ;;  %v3285_v10 = vmul.f32 0.125, %v1263_v0  ;;  %v3287_v44 = vmul.f32 0.125, %v1256_v57 }
 0x283   : > { %v1715_v52 = vadd.f32 %v1675_v56, %v1635_v15  ;;  %v1671_v6 = vrot.slane %v1554_v14, %v2761_v18  ;;  %v1384_v39 = vadd.f32 %v1383_v63, %v1382_v43  ;;  %v1274_v2 = vrot.slane %v1273_v27, 2 }
 0x284   : > { %2463 = vrsqrt.f32 %v1492_v32  ;;  %v1447_v20 = vmul.f32 0.125, %v1391_v1  ;;  %v1463_v28 = vmul.f32 %v3285_v10, %v3285_v10  ;;  %v1462_v40 = vmul.f32 %v3287_v44, %v3287_v44 }
 0x285   : > { %v2462_v12 = vpop.eup %2461  ;;  %v1731_v59 = vmul.f32 0.5, %v1715_v52  ;;  %v1714_v47 = vadd.f32 %v1671_v6, %v1634_v25  ;;  %v1446_v42 = vmul.f32 0.125, %v1384_v39  ;;  %v1275_v7 = vadd.f32 %v1274_v2, %v1273_v27 }
 0x286   : > { %v1525_v53 = vmul.f32 %v2462_v12, %v3127_v30  ;;  %v1479_v45 = vsub.f32 %v1447_v20, %v1463_v28  ;;  %v1305_v60 = vmul.f32 %v3252_v17, %v3252_v17  ;;  %v3299_v22 = vadd.f32 %v3046_v62, %v3198_v58 }
 0x287   : > { %2465 = vtanh.f32 %v1731_v59  ;;  %v1730_v54 = vmul.f32 0.5, %v1714_v47  ;;  %v1478_v49 = vsub.f32 %v1446_v42, %v1462_v40  ;;  %v1276_v23 = vrot.slane %v1275_v7, 1 }
 0x288   : > { %v1541_v35 = vmul.f32 %v1525_v53, %v3235_v24  ;;  %v1603_v19 = vrot.slane %v1525_v53, %v2761_v18  ;;  %v1495_v21 = vadd.f32 1e-05, %v1479_v45  ;;  %v1399_v27 = vsel %vm367_vm2, %v1305_v60, 0.0 }
 0x289   : > { %2467 = vtanh.f32 %v1730_v54  ;;  %v1494_v61 = vadd.f32 1e-05, %v1478_v49  ;;  %v1277_v13 = vadd.f32 %v1276_v23, %v1275_v7  ;;  %v1400_v41 = vrot.slane %v1399_v27, 4 }
 0x28a   : > { %v1557_v46 = vsub.f32 %v3135_v3, %v1541_v35  ;;  %v1637_v58 = vmul.f32 %v1603_v19, %v3186_v29  ;;  %2469 = vrsqrt.f32 %v1495_v21  ;;  %v1264_v43 = vsel %vm367_vm2, %v3299_v22, 0.0 }
 0x28b   : > { %2471 = vrsqrt.f32 %v1494_v61  ;;  %v1401_v31 = vadd.f32 %v1400_v41, %v1399_v27  ;;  %v3308_v24 = vmul.f32 0.125, %v1277_v13  ;;  %v1265_v15 = vrot.slane %v1264_v43, 4 }
 0x28c   : > { %v1683_v8 = vrot.slane %v1557_v46, %v2761_v18  ;;  %v1304_v34 = vmul.f32 %v3299_v22, %v3299_v22  ;;  %v3315_v48 = vadd.f32 %v3206_v36, %v3046_v62  ;;  %v3319_v29 = vadd.f32 %v3046_v62, %v3212_v37 }
 0x28d   : > { %v1402_v0 = vrot.slane %v1401_v31, 2  ;;  %v1465_v33 = vmul.f32 %v3308_v24, %v3308_v24  ;;  %v1266_v57 = vadd.f32 %v1265_v15, %v1264_v43  ;;  %v3324_v56 = vadd.f32 1.0, %v3208_v11 }
 0x28e   : > { %v2464_v14 = vpop.eup %2463  ;;  %v1717_v25 = vadd.f32 %v1683_v8, %v1637_v58  ;;  %v1392_v63 = vsel %vm367_vm2, %v1304_v34, 0.0  ;;  %v1285_v36 = vsel %vm367_vm2, %v3315_v48, 0.0  ;;  %v1307_v32 = vmul.f32 %v3315_v48, %v3315_v48 }
 0x28f   : > { %v1524_v62 = vmul.f32 %v2464_v14, %v3127_v30  ;;  %v1403_v37 = vadd.f32 %v1402_v0, %v1401_v31  ;;  %v1267_v1 = vrot.slane %v1266_v57, 2  ;;  %v1393_v52 = vrot.slane %v1392_v63, 4 }
 0x290   : > { %v1733_v6 = vmul.f32 0.5, %v1717_v25  ;;  %v1286_v39 = vrot.slane %v1285_v36, 4  ;;  %v1413_v11 = vsel %vm367_vm2, %v1307_v32, 0.0  ;;  %v1278_v2 = vsel %vm367_vm2, %v3319_v29, 0.0 }
 0x291   : > { %v3335_v20 = vpop.eup %2465  ;;  %v1540_v28 = vmul.f32 %v1524_v62, %v3268_v16  ;;  %v1599_v40 = vrot.slane %v1524_v62, %v2761_v18  ;;  %v1404_v12 = vrot.slane %v1403_v37, 1  ;;  %v1268_v59 = vadd.f32 %v1267_v1, %v1266_v57 }
 0x292   : > { %2473 = vtanh.f32 %v1733_v6  ;;  %v1394_v47 = vadd.f32 %v1393_v52, %v1392_v63  ;;  %v1287_v42 = vadd.f32 %v1286_v39, %v1285_v36  ;;  %v1414_v7 = vrot.slane %v1413_v11, 4 }
 0x293   : > { %v3339_v53 = vpop.eup %2467  ;;  %v1556_v45 = vsub.f32 %v3135_v3, %v1540_v28  ;;  %v1636_v60 = vmul.f32 %v1599_v40, %v3190_v50  ;;  %v1405_v54 = vadd.f32 %v1404_v12, %v1403_v37  ;;  %v1269_v49 = vrot.slane %v1268_v59, 1 }
 0x294   : > { %v2470_v23 = vpop.eup %2469  ;;  %v1395_v35 = vrot.slane %v1394_v47, 2  ;;  %v1288_v19 = vrot.slane %v1287_v42, 2  ;;  %v1415_v16 = vadd.f32 %v1414_v7, %v1413_v11  ;;  %v1279_v21 = vrot.slane %v1278_v2, 4 }
 0x295   : > { %v2472_v27 = vpop.eup %2471  ;;  %v1679_v61 = vrot.slane %v1556_v45, %v2761_v18  ;;  %v1527_v13 = vmul.f32 %v2470_v23, %v3127_v30  ;;  %v1449_v41 = vmul.f32 0.125, %v1405_v54  ;;  %v1270_v46 = vadd.f32 %v1269_v49, %v1268_v59 }
 0x296   : > { %v1526_v58 = vmul.f32 %v2472_v27, %v3127_v30  ;;  %v1396_v43 = vadd.f32 %v1395_v35, %v1394_v47  ;;  %v1289_v31 = vadd.f32 %v1288_v19, %v1287_v42  ;;  %v1416_v15 = vrot.slane %v1415_v16, 2 }
 0x297   : > { %v1716_v50 = vadd.f32 %v1679_v61, %v1636_v60  ;;  %v1543_v8 = vmul.f32 %v1527_v13, %v3285_v10  ;;  %v1611_v34 = vrot.slane %v1527_v13, %v2761_v18  ;;  %v1481_v0 = vsub.f32 %v1449_v41, %v1465_v33 }
 0x298   : > { %v1542_v57 = vmul.f32 %v1526_v58, %v3287_v44  ;;  %v1607_v14 = vrot.slane %v1526_v58, %v2761_v18  ;;  %v1397_v25 = vrot.slane %v1396_v43, 1  ;;  %v3350_v63 = vmul.f32 0.125, %v1270_v46 }
 0x299   : > { %v1732_v36 = vmul.f32 0.5, %v1716_v50  ;;  %v1559_v32 = vsub.f32 %v3135_v3, %v1543_v8  ;;  %v1639_v62 = vmul.f32 %v1611_v34, %v3244_v4  ;;  %v1497_v37 = vadd.f32 1e-05, %v1481_v0 }
 0x29a   : > { %v1558_v1 = vsub.f32 %v3135_v3, %v1542_v57  ;;  %v1638_v10 = vmul.f32 %v1607_v14, %v3248_v5  ;;  %v1398_v52 = vadd.f32 %v1397_v25, %v1396_v43  ;;  %v1464_v33 = vmul.f32 %v3350_v63, %v3350_v63 }
 0x29b   : > { %2475 = vtanh.f32 %v1732_v36  ;;  %v1691_v44 = vrot.slane %v1559_v32, %v2761_v18  ;;  %v1290_v6 = vrot.slane %v1289_v31, 1  ;;  %v1417_v39 = vadd.f32 %v1416_v15, %v1415_v16 }
 0x29c   : > { %v3359_v11 = vpop.eup %2473  ;;  %v1687_v28 = vrot.slane %v1558_v1, %v2761_v18  ;;  %2477 = vrsqrt.f32 %v1497_v37  ;;  %v1448_v4 = vmul.f32 0.125, %v1398_v52  ;;  %v1280_v40 = vadd.f32 %v1279_v21, %v1278_v2 }
 0x29d   : > { %v1719_v12 = vadd.f32 %v1691_v44, %v1639_v62  ;;  %v1291_v59 = vadd.f32 %v1290_v6, %v1289_v31  ;;  %v1418_v47 = vrot.slane %v1417_v39, 1  ;;  %v1306_v5 = vmul.f32 %v3319_v29, %v3319_v29 }
 0x29e   : > { %v1718_v42 = vadd.f32 %v1687_v28, %v1638_v10  ;;  %v1480_v7 = vsub.f32 %v1448_v4, %v1464_v33  ;;  %v1281_v45 = vrot.slane %v1280_v40, 2  ;;  %v1772_v60 = vmul.f32 0.5, %v3324_v56 }
 0x29f   : > { %v1735_v54 = vmul.f32 0.5, %v1719_v12  ;;  %v1419_v49 = vadd.f32 %v1418_v47, %v1417_v39  ;;  %v3365_v23 = vmul.f32 0.125, %v1291_v59  ;;  %v1406_v35 = vsel %vm367_vm2, %v1306_v5, 0.0 }
 0x2a0   : > { %v1734_v19 = vmul.f32 0.5, %v1718_v42  ;;  %v1496_v16 = vadd.f32 1e-05, %v1480_v7  ;;  %v1282_v2 = vadd.f32 %v1281_v45, %v1280_v40  ;;  %v1407_v21 = vrot.slane %v1406_v35, 4  ;;  %2286 = vmatprep.mubr.msk.f32.mxu0 %vm367_vm2, %v1772_v60 }
 0x2a1   : > { %2479 = vtanh.f32 %v1735_v54  ;;  %v1451_v27 = vmul.f32 0.125, %v1419_v49  ;;  %v1467_v61 = vmul.f32 %v3365_v23, %v3365_v23  ;;  %2287 = vmatmul.mubr.msk.f32.vlgmr.msra.gmra.mrb[8].mxu0 %vm367_vm2, %v3216_v55  ;;  %v1758_v56 = vadd.f32 1.0, %v3232_v9 }
 0x2a2   : > { %2481 = vtanh.f32 %v1734_v19  ;;  %v1283_v13 = vrot.slane %v1282_v2, 1  ;;  %v1408_v41 = vadd.f32 %v1407_v21, %v1406_v35  ;;  %v1759_v46 = vadd.f32 1.0, %v3221_v38 }
 0x2a3   : > { %2483 = vrsqrt.f32 %v1496_v16  ;;  %v1483_v58 = vsub.f32 %v1451_v27, %v1467_v61  ;;  %v1774_v43 = vmul.f32 0.5, %v1758_v56  ;;  %v1760_v31 = vadd.f32 1.0, %v3273_v26 }
 0x2a4   : > { %v1284_v15 = vadd.f32 %v1283_v13, %v1282_v2  ;;  %v1409_v50 = vrot.slane %v1408_v41, 2  ;;  %v1775_v8 = vmul.f32 0.5, %v1759_v46  ;;  %v1761_v34 = vadd.f32 1.0, %v3266_v51 }
 0x2a5   : > { %v2476_v0 = vpop.eup %2475  ;;  %v1499_v57 = vadd.f32 1e-05, %v1483_v58  ;;  %2289 = vmatprep.mubr.msk.f32.mxu0 %vm367_vm2, %v1774_v43  ;;  %v1776_v55 = vmul.f32 0.5, %v1760_v31  ;;  %v1762_v9 = vadd.f32 1.0, %v3339_v53  ;;  %v1763_v37 = vadd.f32 1.0, %v3335_v20 }
 0x2a6   : > { %v2478_v14 = vpop.eup %2477  ;;  %v1410_v25 = vadd.f32 %v1409_v50, %v1408_v41  ;;  %v1434_v38 = vmul.f32 0.125, %v1284_v15  ;;  %2290 = vmatmul.mubr.msk.f32.gmra.mrb[10].mxu0 %vm367_vm2, %v1775_v8  ;;  %v1764_v32 = vadd.f32 1.0, %v2476_v0  ;;  %v1777_v62 = vmul.f32 0.5, %v1761_v34 }
 0x2a7   : > { %v1529_v36 = vmul.f32 %v2478_v14, %v3127_v30  ;;  %2485 = vrsqrt.f32 %v1499_v57  ;;  %2292 = vmatprep.mubr.msk.f32.mxu0 %vm367_vm2, %v1776_v55  ;;  %v1778_v26 = vmul.f32 0.5, %v1762_v9  ;;  %v1765_v39 = vadd.f32 1.0, %v3359_v11 }
 0x2a8   : > { %v1411_v51 = vrot.slane %v1410_v25, 1  ;;  %v1466_v52 = vmul.f32 %v1434_v38, %v1434_v38  ;;  %v1780_v6 = vmul.f32 0.5, %v1764_v32  ;;  %v1779_v40 = vmul.f32 0.5, %v1763_v37 }
 0x2a9   : > { %v1545_v1 = vmul.f32 %v1529_v36, %v3308_v24  ;;  %v1619_v53 = vrot.slane %v1529_v36, %v2761_v18  ;;  %v1781_v7 = vmul.f32 0.5, %v1765_v39 }
 0x2aa   : > { %v1412_v10 = vadd.f32 %v1411_v51, %v1410_v25  ;;  %2293 = vmatmul.mubr.msk.f32.gmra.mrb[12].mxu0 %vm367_vm2, %v1777_v62  ;;  %v3421_v51 = vld [vmem:[%s3512_s1 + $0x4e] ss:$0 sm:$0xff] }
 0x2ab   : > { %v2480_v33 = vpop.eup %2479  ;;  %v1561_v44 = vsub.f32 %v3135_v3, %v1545_v1  ;;  %2295 = vmatprep.mubr.msk.f32.mxu0 %vm367_vm2, %v1778_v26  ;;  %v1641_v24 = vmul.f32 %v1619_v53, %v3252_v17 }
 0x2ac   : > { %v2482_v28 = vpop.eup %2481  ;;  %v1450_v4 = vmul.f32 0.125, %v1412_v10  ;;  %v1767_v49 = vadd.f32 1.0, %v2480_v33 }
 0x2ad   : > { %v2484_v20 = vpop.eup %2483  ;;  %v1699_v12 = vrot.slane %v1561_v44, %v2761_v18  ;;  %v1766_v59 = vadd.f32 1.0, %v2482_v28 }
 0x2ae   : > { %v1528_v47 = vmul.f32 %v2484_v20, %v3127_v30  ;;  %v1482_v5 = vsub.f32 %v1450_v4, %v1466_v52  ;;  %2296 = vmatmul.mubr.msk.f32.gmra.mrb[14].mxu0 %vm367_vm2, %v1779_v40  ;;  %v1783_v27 = vmul.f32 0.5, %v1767_v49 }
 0x2af   : > { %v1721_v42 = vadd.f32 %v1699_v12, %v1641_v24  ;;  %2298 = vmatprep.mubr.msk.f32.mxu0 %vm367_vm2, %v1780_v6  ;;  %v1782_v45 = vmul.f32 0.5, %v1766_v59 }
 0x2b0   : > { %v1544_v11 = vmul.f32 %v1528_v47, %v3350_v63  ;;  %v1615_v60 = vrot.slane %v1528_v47, %v2761_v18  ;;  %v1498_v54 = vadd.f32 1e-05, %v1482_v5 }
 0x2b1   : > { %v2486_v17 = vpop.eup %2485  ;;  %v1737_v16 = vmul.f32 0.5, %v1721_v42 }
 0x2b2   : > { %v1560_v35 = vsub.f32 %v3135_v3, %v1544_v11  ;;  %v1531_v19 = vmul.f32 %v2486_v17, %v3127_v30  ;;  %2487 = vrsqrt.f32 %v1498_v54  ;;  %2299 = vmatmul.mubr.msk.f32.gmra.mrb[16].mxu0 %vm367_vm2, %v1781_v7  ;;  %v1640_v2 = vmul.f32 %v1615_v60, %v3299_v22 }
 0x2b3   : > { %2301 = vmatprep.mubr.msk.f32.mxu0 %vm367_vm2, %v1782_v45  ;;  %2489 = vtanh.f32 %v1737_v16 }
 0x2b4   : > { %v1695_v21 = vrot.slane %v1560_v35, %v2761_v18  ;;  %v1547_v63 = vmul.f32 %v1531_v19, %v3365_v23  ;;  %v1627_v41 = vrot.slane %v1531_v19, %v2761_v18 }
 0x2b6   : > { %v1720_v61 = vadd.f32 %v1695_v21, %v1640_v2  ;;  %v1563_v56 = vsub.f32 %v3135_v3, %v1547_v63  ;;  %2302 = vmatmul.mubr.msk.f32.gmra.mrb[18].mxu0 %vm367_vm2, %v1783_v27  ;;  %v1643_v22 = vmul.f32 %v1627_v41, %v3315_v48 }
 0x2b8   : > { %v1736_v13 = vmul.f32 0.5, %v1720_v61  ;;  %v1707_v46 = vrot.slane %v1563_v56, %v2761_v18 }
 0x2ba   : > { %2491 = vtanh.f32 %v1736_v13  ;;  %v1723_v31 = vadd.f32 %v1707_v46, %v1643_v22 }
 0x2bc   : > { %v2488_v58 = vpop.eup %2487  ;;  %v1739_v34 = vmul.f32 0.5, %v1723_v31 }
 0x2bd   : > { %v1530_v43 = vmul.f32 %v2488_v58, %v3127_v30  ;;  %v2490_v50 = vpop.eup %2489 }
 0x2be   : > { %v1769_v9 = vadd.f32 1.0, %v2490_v50  ;;  %2493 = vtanh.f32 %v1739_v34 }
 0x2bf   : > { %v1546_v23 = vmul.f32 %v1530_v43, %v1434_v38  ;;  %v1623_v15 = vrot.slane %v1530_v43, %v2761_v18 }
 0x2c0   : > { %v1785_v38 = vmul.f32 0.5, %v1769_v9 }
 0x2c1   : > { %v1562_v8 = vsub.f32 %v3135_v3, %v1546_v23  ;;  %v1642_v0 = vmul.f32 %v1623_v15, %v3319_v29 }
 0x2c3   : > { %v1703_v57 = vrot.slane %v1562_v8, %v2761_v18 }
 0x2c4   : > { %v2492_v55 = vpop.eup %2491 }
 0x2c5   : > { %v1722_v14 = vadd.f32 %v1703_v57, %v1642_v0  ;;  %v1768_v25 = vadd.f32 1.0, %v2492_v55 }
 0x2c7   : > { %v1738_v48 = vmul.f32 0.5, %v1722_v14  ;;  %v1784_v30 = vmul.f32 0.5, %v1768_v25 }
 0x2c8   : > { %v2494_v3 = vpop.eup %2493 }
 0x2c9   : > { %2495 = vtanh.f32 %v1738_v48  ;;  %2304 = vmatprep.mubr.msk.f32.mxu0 %vm367_vm2, %v1784_v30  ;;  %v1771_v29 = vadd.f32 1.0, %v2494_v3 }
 0x2ca   : > { %2305 = vmatmul.mubr.msk.f32.gmra.mrb[20].mxu0 %vm367_vm2, %v1785_v38 }
 0x2cb   : > { %v1787_v32 = vmul.f32 0.5, %v1771_v29 }
 0x2d3   : > { %v2496_v36 = vpop.eup %2495 }
 0x2d4   : > { %v1770_v26 = vadd.f32 1.0, %v2496_v36 }
 0x2d6   : > { %v1786_v18 = vmul.f32 0.5, %v1770_v26 }
 0x2d8   : > { %2307 = vmatprep.mubr.msk.f32.mxu0 %vm367_vm2, %v1786_v18 }
 0x2d9   : > { %2308 = vmatmul.mubr.msk.f32.gmra.mrb[22].mxu0 %vm367_vm2, %v1787_v32 }
 0x374   : > { %v2288_v62 = vpop.f32.mrb[8].mxu0 }
 0x375   : > { %v1917_v37 = vadd.f32 %v2288_v62, %v3421_v51  ;;  %v1911_v1 = vpop.f32.mrb[9].mxu0 }
 0x376   : > { %v1912_v53 = vadd.f32 %v3421_v51, %v1911_v1 }
 0x377   : > { %v1991_v10 = vmul.f32 0.03125, %v1917_v37 }
 0x378   : > { %v1990_v52 = vmul.f32 0.03125, %v1912_v53 }
 0x379   : > { %2007 = vst [vmem:[%s3427_s22 + $0x8] sm:$0xff] %v1991_v10  ;;  %v2291_v33 = vpop.f32.mrb[10].mxu0 }
 0x37a   : > { %2006 = vst [vmem:[%s3427_s22] sm:$0xff] %v1990_v52  ;;  %v1927_v44 = vadd.f32 %v2291_v33, %v3421_v51  ;;  %v1921_v6 = vpop.f32.mrb[11].mxu0 }
 0x37b   : > { %v1922_v39 = vadd.f32 %v3421_v51, %v1921_v6 }
 0x37c   : > { %v1993_v28 = vmul.f32 0.03125, %v1927_v44 }
 0x37d   : > { %v1992_v4 = vmul.f32 0.03125, %v1922_v39  ;;  %v2294_v40 = vpop.f32.mrb[12].mxu0 }
 0x37e   : > { %2009 = vst [vmem:[%s3427_s22 + $0x18] sm:$0xff] %v1993_v28  ;;  %v1937_v20 = vadd.f32 %v2294_v40, %v3421_v51  ;;  %v1931_v24 = vpop.f32.mrb[13].mxu0 }
 0x37f   : > { %2008 = vst [vmem:[%s3427_s22 + $0x10] sm:$0xff] %v1992_v4  ;;  %v1932_v12 = vadd.f32 %v3421_v51, %v1931_v24 }
 0x380   : > { %v1995_v59 = vmul.f32 0.03125, %v1937_v20 }
 0x381   : > { %v1994_v47 = vmul.f32 0.03125, %v1932_v12  ;;  %v2297_v5 = vpop.f32.mrb[14].mxu0 }
 0x382   : > { %2011 = vst [vmem:[%s3427_s22 + $0x28] sm:$0xff] %v1995_v59  ;;  %v1947_v42 = vadd.f32 %v2297_v5, %v3421_v51  ;;  %v1941_v7 = vpop.f32.mrb[15].mxu0 }
 0x383   : > { %2010 = vst [vmem:[%s3427_s22 + $0x20] sm:$0xff] %v1994_v47  ;;  %v1942_v45 = vadd.f32 %v3421_v51, %v1941_v7 }
 0x384   : > { %v1997_v11 = vmul.f32 0.03125, %v1947_v42 }
 0x385   : > { %v1996_v60 = vmul.f32 0.03125, %v1942_v45  ;;  %v2300_v54 = vpop.f32.mrb[16].mxu0 }
 0x386   : > { %2013 = vst [vmem:[%s3427_s22 + $0x38] sm:$0xff] %v1997_v11  ;;  %v1957_v49 = vadd.f32 %v2300_v54, %v3421_v51  ;;  %v1951_v17 = vpop.f32.mrb[17].mxu0 }
 0x387   : > { %2012 = vst [vmem:[%s3427_s22 + $0x30] sm:$0xff] %v1996_v60  ;;  %v1952_v35 = vadd.f32 %v3421_v51, %v1951_v17 }
 0x388   : > { %v1999_v19 = vmul.f32 0.03125, %v1957_v49 }
 0x389   : > { %v1998_v16 = vmul.f32 0.03125, %v1952_v35  ;;  %v2303_v2 = vpop.f32.mrb[18].mxu0 }
 0x38a   : > { %2015 = vst [vmem:[%s3427_s22 + $0x48] sm:$0xff] %v1999_v19  ;;  %v1967_v21 = vadd.f32 %v2303_v2, %v3421_v51  ;;  %v1961_v63 = vpop.f32.mrb[19].mxu0 }
 0x38b   : > { %2014 = vst [vmem:[%s3427_s22 + $0x40] sm:$0xff] %v1998_v16  ;;  %v1962_v27 = vadd.f32 %v3421_v51, %v1961_v63 }
 0x38c   : > { %v2001_v61 = vmul.f32 0.03125, %v1967_v21 }
 0x38d   : > { %v2000_v56 = vmul.f32 0.03125, %v1962_v27 }
 0x38e   : > { %2017 = vst [vmem:[%s3427_s22 + $0x58] sm:$0xff] %v2001_v61 }
 0x38f   : > { %2016 = vst [vmem:[%s3427_s22 + $0x50] sm:$0xff] %v2000_v56 }
 0x39d   : > { %v2306_v13 = vpop.f32.mrb[20].mxu0 }
 0x39e   : > { %v1977_v41 = vadd.f32 %v2306_v13, %v3421_v51  ;;  %v1971_v46 = vpop.f32.mrb[21].mxu0 }
 0x39f   : > { %v1972_v58 = vadd.f32 %v3421_v51, %v1971_v46 }
 0x3a0   : > { %v2003_v22 = vmul.f32 0.03125, %v1977_v41 }
 0x3a1   : > { %v2002_v43 = vmul.f32 0.03125, %v1972_v58 }
 0x3a2   : > { %2019 = vst [vmem:[%s3427_s22 + $0x68] sm:$0xff] %v2003_v22 }
 0x3a3   : > { %2018 = vst [vmem:[%s3427_s22 + $0x60] sm:$0xff] %v2002_v43 }
 0x3ac   : > { %v2309_v31 = vpop.f32.mrb[22].mxu0 }
 0x3ad   : > { %v1987_v23 = vadd.f32 %v2309_v31, %v3421_v51  ;;  %v1981_v15 = vpop.f32.mrb[23].mxu0 }
 0x3ae   : > { %v1982_v50 = vadd.f32 %v3421_v51, %v1981_v15 }
 0x3af   : > { %v2005_v8 = vmul.f32 0.03125, %v1987_v23 }
 0x3b0   : > { %v2004_v34 = vmul.f32 0.03125, %v1982_v50 }
 0x3b1   : > { %2021 = vst [vmem:[%s3427_s22 + $0x78] sm:$0xff] %v2005_v8 }
 0x3b2   : > { %2020 = vst [vmem:[%s3427_s22 + $0x70] sm:$0xff] %v2004_v34 }
 0x3b3   : > { %2510 = shalt.err (!%p2507_p3)
}
 0x3b4   : > { %s2511_s4 = scalar_lea.hbm %s3462_s27, 2048  ;;  %s2515_s7 = scalar_lea.hbm %s3513_s2, 8192 }
 0x3b5   : > { %p2512_p4 = scmp.ne.s32.totalorder %s3462_s27, %s2511_s4  ;;  %p2516_p9 = scmp.lt.u32.totalorder %s3462_s27, %s3513_s2 }
 0x3b6   : > { %p2517_p10 = scmp.lt.u32.totalorder %s2515_s7, %s2511_s4  ;;  %p2519_p12 = scmp.lt.u32.totalorder %s2511_s4, %s3462_s27 }
 0x3b7   : > { %p2513_p7 = pnand %p2512_p4, %p2617_p5 }
 0x3b8   : > { %p2518_p11 = por %p2517_p10, %p2516_p9 }
 0x3b9   : > { %p2514_p8 = pneg %p2513_p7 }
 0x3ba   : > { %p2520_p13 = por %p2519_p12, %p2518_p11 }
 0x3bc   : > { %p2521_p0 = pnand %p2520_p13, %p2514_p8 }
 0x3be   : > { %2524 = shalt.err (!%p2521_p0)
}
 0x3bf   : > { %s2562_s16 = smov 128   ;;  %s2563_s17 = smov 8  }
 0x3c0   : > { %2328 = dma.vmem_to_hbm [thread:$0]  (%p2617_p5), %s3464_s24, 2048, %s3462_s27, %s3470_s13, %s2562_s16, %s2562_s16, %s2563_s17  }
 0x3c1 PF: > { %p2334_p1 = scmp.ge.s32.totalorder %s2559_s12, 2  ;;  %s2051_s21 = sand.u32 1, %s2547_s9  }
 0x3c2   : > { %s2052_s22 = scalar_lea.sflag [#allocation3], %s2051_s21 }
 0x3c3   : > { %p2331_p2 = pnand %p2334_p1, %p2621_p6 }
 0x3c5   : > { %2542 = dma.done.wait (!%p2331_p2), %s2052_s22, 2048  }
 0x3c6   : > { %2544 = vsyncadd (!%p2331_p2), %s2052_s22, 4294965248  ;;  %p12_p3 = scmp.ge.s32.totalorder %s2604_s15, 6   ;;  %s3516_s9 = smov %s2551_s10 }
 0x3c7   : > { %s3517_s10 = smov %s2555_s11  ;;  %s3518_s11 = smov %s2615_s18 }
 0x3c8   : > { %s3519_s12 = smov %s2604_s15  ;;  %14 = sbr.rel (!%p12_p3) target bundleno = 3 (0x3), region = 63 }
 0x3cf   :  { %2057 = vsyncpa [#allocation3], 1 }
 0x3d0   :  { %2059 = vsyncpa [#allocation3 + $0x1], 1 }

</bundles_post_ra>
